<compile_context>
chip_gen: v5e
topology: v5e:2x2
jax: 0.10.0
libtpu: 0.0.40
codegen_flags: <defaults>
</compile_context>

<pallas_src>
import functools

import jax
import jax.numpy as jnp
from jax import lax
from jax.experimental import pallas as pl
from jax.experimental.pallas import tpu as pltpu


def _bilstm_kernel(ids_ref, emb_ref, wi_ref, whh_ref, b_ref, out_ref,
                   xp_ref, gx_ref, ht_ref, *, T, Bp):
    """Fused embedding-gather + bidirectional LSTM.

    ids_ref : (T*Bp,)      int32  SMEM   time-major token ids
    emb_ref : (V, E)       f32    VMEM   embedding table
    wi_ref  : (2E, 8H)     bf16   VMEM   packed input weights  (see packer)
    whh_ref : (2H, 8H)     bf16   VMEM   packed recurrent weights (block-diag)
    b_ref   : (1, 8H)      f32    VMEM   packed biases (b_ih + b_hh)
    out_ref : (Bp*T, 2H)   f32    VMEM   batch-major output (row = b*T + t)
    xp_ref  : (T*Bp, 2E)   f32    VMEM   scratch: [x_t | x_{T-1-t}]
    gx_ref  : (T*Bp, 8H)   f32    VMEM   scratch: gate pre-activations
    ht_ref  : (T*Bp, 2H)   f32    VMEM   scratch: time-major hidden staging
    """
    E = emb_ref.shape[1]
    H2 = whh_ref.shape[0]           # 2H
    H = H2 // 2
    H8 = whh_ref.shape[1]           # 8H
    H6 = 6 * H

    # ---- 1) In-kernel embedding gather (+ eval-mode dropout = identity). ----
    # Each token row is written twice: forward stream at its own time step and
    # backward stream time-reversed, so ONE matmul below produces time-aligned
    # gate pre-activations for BOTH directions.
    # TODO(synk): training-mode dropout would mask e_row here with pltpu.prng_*.
    def gather_t(t, carry):
        rf = pl.multiple_of(t * Bp, 8)
        rb = pl.multiple_of((T - 1 - t) * Bp, 8)

        def gather_b(bi, c):
            e_row = emb_ref[pl.ds(ids_ref[rf + bi], 1), :]       # (1, E) f32
            xp_ref[pl.ds(rf + bi, 1), 0:E] = e_row               # fwd  @ t
            xp_ref[pl.ds(rb + bi, 1), E:2 * E] = e_row           # bwd  @ T-1-t
            return c

        return lax.fori_loop(0, Bp, gather_b, carry)

    lax.fori_loop(0, T, gather_t, 0)

    # ---- 2) Hoisted input projection: one MXU matmul for BOTH directions,
    #         biases fused.  gx row-block t holds (gate-major layout)
    #         [i|i|f|f|o|o|g|g] pre-activations for fwd@t and bwd@(T-1-t). ----
    gx_ref[...] = (
        jnp.dot(xp_ref[...].astype(jnp.bfloat16), wi_ref[...],
                preferred_element_type=jnp.float32)
        + b_ref[...]
    )

    whh = whh_ref[...]                                            # (2H, 8H) bf16

    # ---- 3) Fused fwd+bwd recurrence: carries pack both directions,
    #         h = [h_fwd | h_bwd], c = [c_fwd | c_bwd]  (Bp, 2H).  Each step:
    #         one block-diagonal MXU dot, one sigmoid slab, one tanh slab. ----
    def step(i, carry):
        h, c = carry
        rf = pl.multiple_of(i * Bp, 8)               # row block of time i
        rb = pl.multiple_of((T - 1 - i) * Bp, 8)     # row block of time T-1-i
        gates = gx_ref[pl.ds(rf, Bp), :] + jnp.dot(
            h.astype(jnp.bfloat16), whh, preferred_element_type=jnp.float32)
        sig = jax.nn.sigmoid(gates[:, 0:H6])         # [i | f | o], both dirs
        g = jnp.tanh(gates[:, H6:H8])                # [g],          both dirs
        c = sig[:, H2:2 * H2] * c + sig[:, 0:H2] * g
        h = sig[:, 2 * H2:3 * H2] * jnp.tanh(c)
        # time-major staging: contiguous, sublane-aligned stores
        ht_ref[pl.ds(rf, Bp), 0:H] = h[:, 0:H]       # forward half  -> time i
        ht_ref[pl.ds(rb, Bp), H:H2] = h[:, H:H2]     # backward half -> time T-1-i
        return (h, c)

    h0 = jnp.zeros((Bp, H2), jnp.float32)
    c0 = jnp.zeros((Bp, H2), jnp.float32)
    lax.fori_loop(0, T, step, (h0, c0), unroll=min(T, 8))

    # ---- 4) VMEM layout conversion to batch-major (row = b*T + t); replaces
    #         the former wrapper-side transpose (a full HBM pass). Off the
    #         serial recurrent critical path. ----
    def conv_t(t, carry):
        src0 = pl.multiple_of(t * Bp, 8)

        def conv_b(bi, c):
            out_ref[pl.ds(bi * T + t, 1), :] = ht_ref[pl.ds(src0 + bi, 1), :]
            return c

        return lax.fori_loop(0, Bp, conv_b, carry)

    lax.fori_loop(0, T, conv_t, 0)


def bilstm_pallas(ids_tm, emb, wi, whh, b, *, T, Bp):
    """ids_tm: (T*Bp,) int32 time-major.  Returns (Bp*T, 2H) f32 batch-major."""
    E = emb.shape[1]
    H8 = wi.shape[1]
    H = H8 // 8
    TB = T * Bp

    smem = pl.BlockSpec(memory_space=pltpu.MemorySpace.SMEM)
    vmem = pl.BlockSpec(memory_space=pltpu.MemorySpace.VMEM)

    # Explicit VMEM budget (v5e default scoped limit is only 16 MiB).
    buf_bytes = int(
        emb.size * 4 + wi.size * 2 + whh.size * 2 + b.size * 4   # inputs
        + TB * 2 * H * 4                                         # output
        + TB * 2 * E * 4 + TB * H8 * 4 + TB * 2 * H * 4          # scratch
    )
    vmem_limit = max(2 * buf_bytes + (2 << 20), 32 << 20)        # <= v7x 64 MiB

    return pl.pallas_call(
        functools.partial(_bilstm_kernel, T=T, Bp=Bp),
        out_shape=jax.ShapeDtypeStruct((TB, 2 * H), jnp.float32),
        in_specs=[smem, vmem, vmem, vmem, vmem],
        out_specs=vmem,
        scratch_shapes=[
            pltpu.VMEM((TB, 2 * E), jnp.float32),   # xp: [x_t | x_{T-1-t}]
            pltpu.VMEM((TB, H8), jnp.float32),      # gx: gate pre-activations
            pltpu.VMEM((TB, 2 * H), jnp.float32),   # ht: time-major staging
        ],
        compiler_params=pltpu.CompilerParams(vmem_limit_bytes=vmem_limit),
    )(ids_tm, emb, wi, whh, b)


def _pack_bilstm_weights(wih_f, whh_f, b_f, wih_b, whh_b, b_b):
    """Pack per-direction LSTM weights into the kernel's fused layout.

    Inputs use the transposed-PyTorch convention:
      wih_*: (E, 4H), whh_*: (H, 4H), b_*: (1, 4H), gate column order [i,f,g,o]
      (PyTorch weight_ih_l0 is (4H, E) with row blocks [i,f,g,o]; transpose it,
       and b_* = b_ih + b_hh).
    Output (gate-major, direction-minor, gate order [i, f, o, g]):
      wi : (2E, 8H)  rows [x_t | x_{T-1-t}] -> cols [i_f,i_b,f_f,f_b,o_f,o_b,g_f,g_b]
      whh: (2H, 8H)  rows [h_f | h_b]       -> same columns (block-diagonal)
      b  : (1, 8H)
    """
    E = wih_f.shape[0]
    H = whh_f.shape[0]

    def split(w):  # PyTorch column blocks [i, f, g, o]
        return w[:, 0:H], w[:, H:2 * H], w[:, 2 * H:3 * H], w[:, 3 * H:4 * H]

    i_f, f_f, g_f, o_f = split(wih_f)
    i_b, f_b, g_b, o_b = split(wih_b)
    z_e = jnp.zeros((E, H), jnp.float32)
    wi = jnp.concatenate([
        jnp.concatenate([i_f, z_e, f_f, z_e, o_f, z_e, g_f, z_e], axis=1),
        jnp.concatenate([z_e, i_b, z_e, f_b, z_e, o_b, z_e, g_b], axis=1),
    ], axis=0)

    ri_f, rf_f, rg_f, ro_f = split(whh_f)
    ri_b, rf_b, rg_b, ro_b = split(whh_b)
    z_h = jnp.zeros((H, H), jnp.float32)
    whh = jnp.concatenate([
        jnp.concatenate([ri_f, z_h, rf_f, z_h, ro_f, z_h, rg_f, z_h], axis=1),
        jnp.concatenate([z_h, ri_b, z_h, rf_b, z_h, ro_b, z_h, rg_b], axis=1),
    ], axis=0)

    bi_f, bf_f, bg_f, bo_f = split(b_f)
    bi_b, bf_b, bg_b, bo_b = split(b_b)
    bias = jnp.concatenate(
        [bi_f, bi_b, bf_f, bf_b, bo_f, bo_b, bg_f, bg_b], axis=1)

    return (wi.astype(jnp.bfloat16), whh.astype(jnp.bfloat16),
            bias.astype(jnp.float32))


def init_params(key, len_words, embedding_dim, len_hidden):
    """Init mirroring the PyTorch module (xavier-normal emb, U(-1/sqrt(H),..))."""
    k = jax.random.split(key, 9)
    std = (2.0 / (len_words + embedding_dim)) ** 0.5
    emb = jax.random.normal(k[0], (len_words, embedding_dim), jnp.float32) * std

    bound = 1.0 / (len_hidden ** 0.5)
    H4 = 4 * len_hidden

    def u(kk, shape):
        return jax.random.uniform(kk, shape, jnp.float32, -bound, bound)

    wih_f = u(k[1], (embedding_dim, H4))
    whh_f = u(k[2], (len_hidden, H4))
    b_f = u(k[3], (1, H4)) + u(k[4], (1, H4))
    wih_b = u(k[5], (embedding_dim, H4))
    whh_b = u(k[6], (len_hidden, H4))
    b_b = u(k[7], (1, H4)) + u(k[8], (1, H4))

    wi, whh, b = _pack_bilstm_weights(wih_f, whh_f, b_f, wih_b, whh_b, b_b)
    params = dict(emb=emb, wi=wi, whh=whh, b=b)
    raw = dict(emb=emb, wih_f=wih_f, whh_f=whh_f, b_f=b_f,
               wih_b=wih_b, whh_b=whh_b, b_b=b_b)
    return params, raw


@jax.jit
def input_encoding_forward(x_ids, params):
    """x_ids: (B, T) int32 token ids  ->  (B, T, 2H) float32."""
    B, T = x_ids.shape
    H = params["wi"].shape[1] // 8

    # Pad batch to a multiple of 8 so every per-step row block is sublane
    # aligned; padded rows compute throwaway values sliced off below.
    Bp = ((B + 7) // 8) * 8
    ids_p = jnp.pad(x_ids.astype(jnp.int32), ((0, Bp - B), (0, 0)))
    ids_tm = ids_p.T.reshape(-1)                    # (T*Bp,) time-major ids

    out_flat = bilstm_pallas(ids_tm, params["emb"], params["wi"],
                             params["whh"], params["b"], T=T, Bp=Bp)
    # (Bp*T, 2H) batch-major rows -> (Bp, T, 2H) is a free reshape; no transpose.
    return out_flat.reshape(Bp, T, 2 * H)[:B]


def _reference_forward(x_ids, raw):
    """Pure-JAX float32 bidirectional LSTM (PyTorch semantics), for validation."""
    x = jnp.take(raw["emb"], x_ids, axis=0)          # (B, T, E)
    H = raw["whh_f"].shape[0]

    def run(wih, whh, bias, xs):                     # xs: (T, B, E)
        def cell(carry, xt):
            h, c = carry
            gates = xt @ wih + h @ whh + bias        # (B, 4H) [i, f, g, o]
            i = jax.nn.sigmoid(gates[:, 0:H])
            f = jax.nn.sigmoid(gates[:, H:2 * H])
            g = jnp.tanh(gates[:, 2 * H:3 * H])
            o = jax.nn.sigmoid(gates[:, 3 * H:4 * H])
            c = f * c + i * g
            h = o * jnp.tanh(c)
            return (h, c), h

        h0 = jnp.zeros((x.shape[0], H), jnp.float32)
        _, hs = lax.scan(cell, (h0, h0), xs)
        return hs                                    # (T, B, H)

    xs = jnp.transpose(x, (1, 0, 2))
    hf = run(raw["wih_f"], raw["whh_f"], raw["b_f"], xs)
    hb = run(raw["wih_b"], raw["whh_b"], raw["b_b"], xs[::-1])[::-1]
    return jnp.transpose(jnp.concatenate([hf, hb], axis=-1), (1, 0, 2))


if __name__ == "__main__":
    # small shapes consistent with the module's forward
    B, T = 2, 8                 # batch, sequence length (longest)
    len_words = 50              # vocab size
    embedding_dim = 32
    len_hidden = 32

    key = jax.random.PRNGKey(0)
    kp, kx = jax.random.split(key)
    params, raw = init_params(kp, len_words, embedding_dim, len_hidden)
    x_ids = jax.random.randint(kx, (B, T), 0, len_words, dtype=jnp.int32)

    out = input_encoding_forward(x_ids, params)
    out = jax.block_until_ready(out)

    assert out.shape == (B, T, 2 * len_hidden), out.shape
    assert out.dtype == jnp.float32
    assert bool(jnp.all(jnp.isfinite(out)))

    # Validate against a pure-JAX float32 bidirectional LSTM (bf16 MXU operands
    # in the kernel -> compare with a tolerance, not exact equality).
    ref = _reference_forward(x_ids, raw)
    err = float(jnp.max(jnp.abs(out - ref)))
    assert err < 2e-2, f"kernel/reference mismatch: max abs err {err}"

    print("KERNEL_OK")
</pallas_src>

<mosaic_0001>
module attributes {stable_mosaic.version = 11 : i64} {
  func.func @_bilstm_kernel(%arg0: memref<64xi32, #tpu.memory_space<smem>>, %arg1: memref<50x32xf32, #tpu.memory_space<vmem>>, %arg2: memref<64x256xbf16, #tpu.memory_space<vmem>>, %arg3: memref<64x256xbf16, #tpu.memory_space<vmem>>, %arg4: memref<1x256xf32, #tpu.memory_space<vmem>>, %arg5: memref<64x64xf32, #tpu.memory_space<vmem>>, %arg6: memref<64x64xf32, #tpu.memory_space<vmem>>, %arg7: memref<64x256xf32, #tpu.memory_space<vmem>>, %arg8: memref<64x64xf32, #tpu.memory_space<vmem>>) attributes {dimension_semantics = [], scalar_prefetch = 0 : i64, scratch_operands = 3 : i64, tpu.core_type = #tpu.core_type<tc>} {
    %c0_i32 = arith.constant 0 : i32
    %c8_i32 = arith.constant 8 : i32
    %0 = arith.addi %c0_i32, %c8_i32 : i32
    %c1_i32 = arith.constant 1 : i32
    scf.for %arg9 = %c0_i32 to %0 step %c1_i32  : i32 {
      %c8_i32_82 = arith.constant 8 : i32
      %269 = arith.muli %arg9, %c8_i32_82 : i32
      %270 = tpu.assume_multiple %269, 8 : i32
      %c7_i32_83 = arith.constant 7 : i32
      %271 = arith.subi %c7_i32_83, %arg9 : i32
      %c8_i32_84 = arith.constant 8 : i32
      %272 = arith.muli %271, %c8_i32_84 : i32
      %273 = tpu.assume_multiple %272, 8 : i32
      %c0_i32_85 = arith.constant 0 : i32
      %c8_i32_86 = arith.constant 8 : i32
      %274 = arith.addi %c0_i32_85, %c8_i32_86 : i32
      %c1_i32_87 = arith.constant 1 : i32
      scf.for %arg10 = %c0_i32_85 to %274 step %c1_i32_87  : i32 {
        %275 = arith.addi %270, %arg10 : i32
        %276 = arith.index_cast %275 : i32 to index
        %277 = memref.load %arg0[%276] : memref<64xi32, #tpu.memory_space<smem>>
        %278 = arith.index_cast %277 : i32 to index
        %c0_89 = arith.constant 0 : index
        %279 = vector.load %arg1[%278, %c0_89] : memref<50x32xf32, #tpu.memory_space<vmem>>, vector<1x32xf32>
        %280 = arith.addi %270, %arg10 : i32
        %281 = arith.index_cast %280 : i32 to index
        %c0_90 = arith.constant 0 : index
        %282 = vector.load %arg6[%281, %c0_90] : memref<64x64xf32, #tpu.memory_space<vmem>>, vector<1x32xf32>
        tpu.vector_store %arg6[%281, %c0_90], %279 {strides = array<i32>} : memref<64x64xf32, #tpu.memory_space<vmem>>, vector<1x32xf32>,
        %283 = arith.addi %273, %arg10 : i32
        %284 = arith.index_cast %283 : i32 to index
        %c32_91 = arith.constant 32 : index
        %285 = vector.load %arg6[%284, %c32_91] : memref<64x64xf32, #tpu.memory_space<vmem>>, vector<1x32xf32>
        tpu.vector_store %arg6[%284, %c32_91], %279 {strides = array<i32>} : memref<64x64xf32, #tpu.memory_space<vmem>>, vector<1x32xf32>,
      }
      %c8_i32_88 = arith.constant 8 : i32
    }
    %c8_i32_0 = arith.constant 8 : i32
    %c0 = arith.constant 0 : index
    %c0_1 = arith.constant 0 : index
    %1 = vector.load %arg6[%c0, %c0_1] : memref<64x64xf32, #tpu.memory_space<vmem>>, vector<64x64xf32>
    %2 = arith.truncf %1 : vector<64x64xf32> to vector<64x64xbf16>
    %c0_2 = arith.constant 0 : index
    %c0_3 = arith.constant 0 : index
    %3 = vector.load %arg2[%c0_2, %c0_3] : memref<64x256xbf16, #tpu.memory_space<vmem>>, vector<64x256xbf16>
    %cst = arith.constant dense<0.000000e+00> : vector<64x256xf32>
    %4 = tpu.matmul %2, %3, %cst {dimension_numbers = #tpu.dot_dimension_numbers<[1], [0], [0], [1], [0, 0, 1, 1], [], []>} : vector<64x64xbf16>, vector<64x256xbf16>, vector<64x256xf32> -> vector<64x256xf32>
    %c0_4 = arith.constant 0 : index
    %c0_5 = arith.constant 0 : index
    %5 = vector.load %arg4[%c0_4, %c0_5] : memref<1x256xf32, #tpu.memory_space<vmem>>, vector<1x256xf32>
    %6 = vector.broadcast %5 : vector<1x256xf32> to vector<64x256xf32>
    %7 = arith.addf %4, %6 : vector<64x256xf32>
    %c0_6 = arith.constant 0 : index
    %c0_7 = arith.constant 0 : index
    %8 = vector.load %arg7[%c0_6, %c0_7] : memref<64x256xf32, #tpu.memory_space<vmem>>, vector<64x256xf32>
    tpu.vector_store %arg7[%c0_6, %c0_7], %7 {strides = array<i32>} : memref<64x256xf32, #tpu.memory_space<vmem>>, vector<64x256xf32>,
    %c0_8 = arith.constant 0 : index
    %c0_9 = arith.constant 0 : index
    %9 = vector.load %arg3[%c0_8, %c0_9] : memref<64x256xbf16, #tpu.memory_space<vmem>>, vector<64x256xbf16>
    %cst_10 = arith.constant 0.000000e+00 : f32
    %10 = vector.broadcast %cst_10 : f32 to vector<8x64xf32>
    %cst_11 = arith.constant 0.000000e+00 : f32
    %11 = vector.broadcast %cst_11 : f32 to vector<8x64xf32>
    %c0_i32_12 = arith.constant 0 : i32
    %c8_i32_13 = arith.constant 8 : i32
    %12 = arith.muli %c0_i32_12, %c8_i32_13 : i32
    %13 = tpu.assume_multiple %12, 8 : i32
    %c7_i32 = arith.constant 7 : i32
    %14 = arith.subi %c7_i32, %c0_i32_12 : i32
    %c8_i32_14 = arith.constant 8 : i32
    %15 = arith.muli %14, %c8_i32_14 : i32
    %16 = tpu.assume_multiple %15, 8 : i32
    %17 = arith.index_cast %13 : i32 to index
    %c0_15 = arith.constant 0 : index
    %18 = vector.load %arg7[%17, %c0_15] : memref<64x256xf32, #tpu.memory_space<vmem>>, vector<8x256xf32>
    %19 = arith.truncf %10 : vector<8x64xf32> to vector<8x64xbf16>
    %cst_16 = arith.constant dense<0.000000e+00> : vector<8x256xf32>
    %20 = tpu.matmul %19, %9, %cst_16 {dimension_numbers = #tpu.dot_dimension_numbers<[1], [0], [0], [1], [0, 0, 1, 1], [], []>} : vector<8x64xbf16>, vector<64x256xbf16>, vector<8x256xf32> -> vector<8x256xf32>
    %21 = arith.addf %18, %20 : vector<8x256xf32>
    %22 = vector.extract_strided_slice %21 {offsets = [0, 0], sizes = [8, 192], strides = [1, 1]} : vector<8x256xf32> to vector<8x192xf32>
    %23 = arith.negf %22 : vector<8x192xf32>
    %24 = math.exp %23 : vector<8x192xf32>
    %cst_17 = arith.constant 1.000000e+00 : f32
    %25 = vector.broadcast %cst_17 : f32 to vector<8x192xf32>
    %26 = arith.addf %25, %24 : vector<8x192xf32>
    %27 = arith.divf %25, %26 : vector<8x192xf32>
    %28 = vector.extract_strided_slice %21 {offsets = [0, 192], sizes = [8, 64], strides = [1, 1]} : vector<8x256xf32> to vector<8x64xf32>
    %29 = math.tanh %28 : vector<8x64xf32>
    %30 = vector.extract_strided_slice %27 {offsets = [0, 64], sizes = [8, 64], strides = [1, 1]} : vector<8x192xf32> to vector<8x64xf32>
    %31 = arith.mulf %30, %11 : vector<8x64xf32>
    %32 = vector.extract_strided_slice %27 {offsets = [0, 0], sizes = [8, 64], strides = [1, 1]} : vector<8x192xf32> to vector<8x64xf32>
    %33 = arith.mulf %32, %29 : vector<8x64xf32>
    %34 = arith.addf %31, %33 : vector<8x64xf32>
    %35 = vector.extract_strided_slice %27 {offsets = [0, 128], sizes = [8, 64], strides = [1, 1]} : vector<8x192xf32> to vector<8x64xf32>
    %36 = math.tanh %34 : vector<8x64xf32>
    %37 = arith.mulf %35, %36 : vector<8x64xf32>
    %38 = vector.extract_strided_slice %37 {offsets = [0, 0], sizes = [8, 32], strides = [1, 1]} : vector<8x64xf32> to vector<8x32xf32>
    %39 = arith.index_cast %13 : i32 to index
    %c0_18 = arith.constant 0 : index
    %40 = vector.load %arg8[%39, %c0_18] : memref<64x64xf32, #tpu.memory_space<vmem>>, vector<8x32xf32>
    tpu.vector_store %arg8[%39, %c0_18], %38 {strides = array<i32>} : memref<64x64xf32, #tpu.memory_space<vmem>>, vector<8x32xf32>,
    %41 = vector.extract_strided_slice %37 {offsets = [0, 32], sizes = [8, 32], strides = [1, 1]} : vector<8x64xf32> to vector<8x32xf32>
    %42 = arith.index_cast %16 : i32 to index
    %c32 = arith.constant 32 : index
    %43 = vector.load %arg8[%42, %c32] : memref<64x64xf32, #tpu.memory_space<vmem>>, vector<8x32xf32>
    tpu.vector_store %arg8[%42, %c32], %41 {strides = array<i32>} : memref<64x64xf32, #tpu.memory_space<vmem>>, vector<8x32xf32>,
    %c1_i32_19 = arith.constant 1 : i32
    %c8_i32_20 = arith.constant 8 : i32
    %44 = arith.muli %c1_i32_19, %c8_i32_20 : i32
    %45 = tpu.assume_multiple %44, 8 : i32
    %c7_i32_21 = arith.constant 7 : i32
    %46 = arith.subi %c7_i32_21, %c1_i32_19 : i32
    %c8_i32_22 = arith.constant 8 : i32
    %47 = arith.muli %46, %c8_i32_22 : i32
    %48 = tpu.assume_multiple %47, 8 : i32
    %49 = arith.index_cast %45 : i32 to index
    %c0_23 = arith.constant 0 : index
    %50 = vector.load %arg7[%49, %c0_23] : memref<64x256xf32, #tpu.memory_space<vmem>>, vector<8x256xf32>
    %51 = arith.truncf %37 : vector<8x64xf32> to vector<8x64xbf16>
    %cst_24 = arith.constant dense<0.000000e+00> : vector<8x256xf32>
    %52 = tpu.matmul %51, %9, %cst_24 {dimension_numbers = #tpu.dot_dimension_numbers<[1], [0], [0], [1], [0, 0, 1, 1], [], []>} : vector<8x64xbf16>, vector<64x256xbf16>, vector<8x256xf32> -> vector<8x256xf32>
    %53 = arith.addf %50, %52 : vector<8x256xf32>
    %54 = vector.extract_strided_slice %53 {offsets = [0, 0], sizes = [8, 192], strides = [1, 1]} : vector<8x256xf32> to vector<8x192xf32>
    %55 = arith.negf %54 : vector<8x192xf32>
    %56 = math.exp %55 : vector<8x192xf32>
    %cst_25 = arith.constant 1.000000e+00 : f32
    %57 = vector.broadcast %cst_25 : f32 to vector<8x192xf32>
    %58 = arith.addf %57, %56 : vector<8x192xf32>
    %59 = arith.divf %57, %58 : vector<8x192xf32>
    %60 = vector.extract_strided_slice %53 {offsets = [0, 192], sizes = [8, 64], strides = [1, 1]} : vector<8x256xf32> to vector<8x64xf32>
    %61 = math.tanh %60 : vector<8x64xf32>
    %62 = vector.extract_strided_slice %59 {offsets = [0, 64], sizes = [8, 64], strides = [1, 1]} : vector<8x192xf32> to vector<8x64xf32>
    %63 = arith.mulf %62, %34 : vector<8x64xf32>
    %64 = vector.extract_strided_slice %59 {offsets = [0, 0], sizes = [8, 64], strides = [1, 1]} : vector<8x192xf32> to vector<8x64xf32>
    %65 = arith.mulf %64, %61 : vector<8x64xf32>
    %66 = arith.addf %63, %65 : vector<8x64xf32>
    %67 = vector.extract_strided_slice %59 {offsets = [0, 128], sizes = [8, 64], strides = [1, 1]} : vector<8x192xf32> to vector<8x64xf32>
    %68 = math.tanh %66 : vector<8x64xf32>
    %69 = arith.mulf %67, %68 : vector<8x64xf32>
    %70 = vector.extract_strided_slice %69 {offsets = [0, 0], sizes = [8, 32], strides = [1, 1]} : vector<8x64xf32> to vector<8x32xf32>
    %71 = arith.index_cast %45 : i32 to index
    %c0_26 = arith.constant 0 : index
    %72 = vector.load %arg8[%71, %c0_26] : memref<64x64xf32, #tpu.memory_space<vmem>>, vector<8x32xf32>
    tpu.vector_store %arg8[%71, %c0_26], %70 {strides = array<i32>} : memref<64x64xf32, #tpu.memory_space<vmem>>, vector<8x32xf32>,
    %73 = vector.extract_strided_slice %69 {offsets = [0, 32], sizes = [8, 32], strides = [1, 1]} : vector<8x64xf32> to vector<8x32xf32>
    %74 = arith.index_cast %48 : i32 to index
    %c32_27 = arith.constant 32 : index
    %75 = vector.load %arg8[%74, %c32_27] : memref<64x64xf32, #tpu.memory_space<vmem>>, vector<8x32xf32>
    tpu.vector_store %arg8[%74, %c32_27], %73 {strides = array<i32>} : memref<64x64xf32, #tpu.memory_space<vmem>>, vector<8x32xf32>,
    %c2_i32 = arith.constant 2 : i32
    %c8_i32_28 = arith.constant 8 : i32
    %76 = arith.muli %c2_i32, %c8_i32_28 : i32
    %77 = tpu.assume_multiple %76, 8 : i32
    %c7_i32_29 = arith.constant 7 : i32
    %78 = arith.subi %c7_i32_29, %c2_i32 : i32
    %c8_i32_30 = arith.constant 8 : i32
    %79 = arith.muli %78, %c8_i32_30 : i32
    %80 = tpu.assume_multiple %79, 8 : i32
    %81 = arith.index_cast %77 : i32 to index
    %c0_31 = arith.constant 0 : index
    %82 = vector.load %arg7[%81, %c0_31] : memref<64x256xf32, #tpu.memory_space<vmem>>, vector<8x256xf32>
    %83 = arith.truncf %69 : vector<8x64xf32> to vector<8x64xbf16>
    %cst_32 = arith.constant dense<0.000000e+00> : vector<8x256xf32>
    %84 = tpu.matmul %83, %9, %cst_32 {dimension_numbers = #tpu.dot_dimension_numbers<[1], [0], [0], [1], [0, 0, 1, 1], [], []>} : vector<8x64xbf16>, vector<64x256xbf16>, vector<8x256xf32> -> vector<8x256xf32>
    %85 = arith.addf %82, %84 : vector<8x256xf32>
    %86 = vector.extract_strided_slice %85 {offsets = [0, 0], sizes = [8, 192], strides = [1, 1]} : vector<8x256xf32> to vector<8x192xf32>
    %87 = arith.negf %86 : vector<8x192xf32>
    %88 = math.exp %87 : vector<8x192xf32>
    %cst_33 = arith.constant 1.000000e+00 : f32
    %89 = vector.broadcast %cst_33 : f32 to vector<8x192xf32>
    %90 = arith.addf %89, %88 : vector<8x192xf32>
    %91 = arith.divf %89, %90 : vector<8x192xf32>
    %92 = vector.extract_strided_slice %85 {offsets = [0, 192], sizes = [8, 64], strides = [1, 1]} : vector<8x256xf32> to vector<8x64xf32>
    %93 = math.tanh %92 : vector<8x64xf32>
    %94 = vector.extract_strided_slice %91 {offsets = [0, 64], sizes = [8, 64], strides = [1, 1]} : vector<8x192xf32> to vector<8x64xf32>
    %95 = arith.mulf %94, %66 : vector<8x64xf32>
    %96 = vector.extract_strided_slice %91 {offsets = [0, 0], sizes = [8, 64], strides = [1, 1]} : vector<8x192xf32> to vector<8x64xf32>
    %97 = arith.mulf %96, %93 : vector<8x64xf32>
    %98 = arith.addf %95, %97 : vector<8x64xf32>
    %99 = vector.extract_strided_slice %91 {offsets = [0, 128], sizes = [8, 64], strides = [1, 1]} : vector<8x192xf32> to vector<8x64xf32>
    %100 = math.tanh %98 : vector<8x64xf32>
    %101 = arith.mulf %99, %100 : vector<8x64xf32>
    %102 = vector.extract_strided_slice %101 {offsets = [0, 0], sizes = [8, 32], strides = [1, 1]} : vector<8x64xf32> to vector<8x32xf32>
    %103 = arith.index_cast %77 : i32 to index
    %c0_34 = arith.constant 0 : index
    %104 = vector.load %arg8[%103, %c0_34] : memref<64x64xf32, #tpu.memory_space<vmem>>, vector<8x32xf32>
    tpu.vector_store %arg8[%103, %c0_34], %102 {strides = array<i32>} : memref<64x64xf32, #tpu.memory_space<vmem>>, vector<8x32xf32>,
    %105 = vector.extract_strided_slice %101 {offsets = [0, 32], sizes = [8, 32], strides = [1, 1]} : vector<8x64xf32> to vector<8x32xf32>
    %106 = arith.index_cast %80 : i32 to index
    %c32_35 = arith.constant 32 : index
    %107 = vector.load %arg8[%106, %c32_35] : memref<64x64xf32, #tpu.memory_space<vmem>>, vector<8x32xf32>
    tpu.vector_store %arg8[%106, %c32_35], %105 {strides = array<i32>} : memref<64x64xf32, #tpu.memory_space<vmem>>, vector<8x32xf32>,
    %c3_i32 = arith.constant 3 : i32
    %c8_i32_36 = arith.constant 8 : i32
    %108 = arith.muli %c3_i32, %c8_i32_36 : i32
    %109 = tpu.assume_multiple %108, 8 : i32
    %c7_i32_37 = arith.constant 7 : i32
    %110 = arith.subi %c7_i32_37, %c3_i32 : i32
    %c8_i32_38 = arith.constant 8 : i32
    %111 = arith.muli %110, %c8_i32_38 : i32
    %112 = tpu.assume_multiple %111, 8 : i32
    %113 = arith.index_cast %109 : i32 to index
    %c0_39 = arith.constant 0 : index
    %114 = vector.load %arg7[%113, %c0_39] : memref<64x256xf32, #tpu.memory_space<vmem>>, vector<8x256xf32>
    %115 = arith.truncf %101 : vector<8x64xf32> to vector<8x64xbf16>
    %cst_40 = arith.constant dense<0.000000e+00> : vector<8x256xf32>
    %116 = tpu.matmul %115, %9, %cst_40 {dimension_numbers = #tpu.dot_dimension_numbers<[1], [0], [0], [1], [0, 0, 1, 1], [], []>} : vector<8x64xbf16>, vector<64x256xbf16>, vector<8x256xf32> -> vector<8x256xf32>
    %117 = arith.addf %114, %116 : vector<8x256xf32>
    %118 = vector.extract_strided_slice %117 {offsets = [0, 0], sizes = [8, 192], strides = [1, 1]} : vector<8x256xf32> to vector<8x192xf32>
    %119 = arith.negf %118 : vector<8x192xf32>
    %120 = math.exp %119 : vector<8x192xf32>
    %cst_41 = arith.constant 1.000000e+00 : f32
    %121 = vector.broadcast %cst_41 : f32 to vector<8x192xf32>
    %122 = arith.addf %121, %120 : vector<8x192xf32>
    %123 = arith.divf %121, %122 : vector<8x192xf32>
    %124 = vector.extract_strided_slice %117 {offsets = [0, 192], sizes = [8, 64], strides = [1, 1]} : vector<8x256xf32> to vector<8x64xf32>
    %125 = math.tanh %124 : vector<8x64xf32>
    %126 = vector.extract_strided_slice %123 {offsets = [0, 64], sizes = [8, 64], strides = [1, 1]} : vector<8x192xf32> to vector<8x64xf32>
    %127 = arith.mulf %126, %98 : vector<8x64xf32>
    %128 = vector.extract_strided_slice %123 {offsets = [0, 0], sizes = [8, 64], strides = [1, 1]} : vector<8x192xf32> to vector<8x64xf32>
    %129 = arith.mulf %128, %125 : vector<8x64xf32>
    %130 = arith.addf %127, %129 : vector<8x64xf32>
    %131 = vector.extract_strided_slice %123 {offsets = [0, 128], sizes = [8, 64], strides = [1, 1]} : vector<8x192xf32> to vector<8x64xf32>
    %132 = math.tanh %130 : vector<8x64xf32>
    %133 = arith.mulf %131, %132 : vector<8x64xf32>
    %134 = vector.extract_strided_slice %133 {offsets = [0, 0], sizes = [8, 32], strides = [1, 1]} : vector<8x64xf32> to vector<8x32xf32>
    %135 = arith.index_cast %109 : i32 to index
    %c0_42 = arith.constant 0 : index
    %136 = vector.load %arg8[%135, %c0_42] : memref<64x64xf32, #tpu.memory_space<vmem>>, vector<8x32xf32>
    tpu.vector_store %arg8[%135, %c0_42], %134 {strides = array<i32>} : memref<64x64xf32, #tpu.memory_space<vmem>>, vector<8x32xf32>,
    %137 = vector.extract_strided_slice %133 {offsets = [0, 32], sizes = [8, 32], strides = [1, 1]} : vector<8x64xf32> to vector<8x32xf32>
    %138 = arith.index_cast %112 : i32 to index
    %c32_43 = arith.constant 32 : index
    %139 = vector.load %arg8[%138, %c32_43] : memref<64x64xf32, #tpu.memory_space<vmem>>, vector<8x32xf32>
    tpu.vector_store %arg8[%138, %c32_43], %137 {strides = array<i32>} : memref<64x64xf32, #tpu.memory_space<vmem>>, vector<8x32xf32>,
    %c4_i32 = arith.constant 4 : i32
    %c8_i32_44 = arith.constant 8 : i32
    %140 = arith.muli %c4_i32, %c8_i32_44 : i32
    %141 = tpu.assume_multiple %140, 8 : i32
    %c7_i32_45 = arith.constant 7 : i32
    %142 = arith.subi %c7_i32_45, %c4_i32 : i32
    %c8_i32_46 = arith.constant 8 : i32
    %143 = arith.muli %142, %c8_i32_46 : i32
    %144 = tpu.assume_multiple %143, 8 : i32
    %145 = arith.index_cast %141 : i32 to index
    %c0_47 = arith.constant 0 : index
    %146 = vector.load %arg7[%145, %c0_47] : memref<64x256xf32, #tpu.memory_space<vmem>>, vector<8x256xf32>
    %147 = arith.truncf %133 : vector<8x64xf32> to vector<8x64xbf16>
    %cst_48 = arith.constant dense<0.000000e+00> : vector<8x256xf32>
    %148 = tpu.matmul %147, %9, %cst_48 {dimension_numbers = #tpu.dot_dimension_numbers<[1], [0], [0], [1], [0, 0, 1, 1], [], []>} : vector<8x64xbf16>, vector<64x256xbf16>, vector<8x256xf32> -> vector<8x256xf32>
    %149 = arith.addf %146, %148 : vector<8x256xf32>
    %150 = vector.extract_strided_slice %149 {offsets = [0, 0], sizes = [8, 192], strides = [1, 1]} : vector<8x256xf32> to vector<8x192xf32>
    %151 = arith.negf %150 : vector<8x192xf32>
    %152 = math.exp %151 : vector<8x192xf32>
    %cst_49 = arith.constant 1.000000e+00 : f32
    %153 = vector.broadcast %cst_49 : f32 to vector<8x192xf32>
    %154 = arith.addf %153, %152 : vector<8x192xf32>
    %155 = arith.divf %153, %154 : vector<8x192xf32>
    %156 = vector.extract_strided_slice %149 {offsets = [0, 192], sizes = [8, 64], strides = [1, 1]} : vector<8x256xf32> to vector<8x64xf32>
    %157 = math.tanh %156 : vector<8x64xf32>
    %158 = vector.extract_strided_slice %155 {offsets = [0, 64], sizes = [8, 64], strides = [1, 1]} : vector<8x192xf32> to vector<8x64xf32>
    %159 = arith.mulf %158, %130 : vector<8x64xf32>
    %160 = vector.extract_strided_slice %155 {offsets = [0, 0], sizes = [8, 64], strides = [1, 1]} : vector<8x192xf32> to vector<8x64xf32>
    %161 = arith.mulf %160, %157 : vector<8x64xf32>
    %162 = arith.addf %159, %161 : vector<8x64xf32>
    %163 = vector.extract_strided_slice %155 {offsets = [0, 128], sizes = [8, 64], strides = [1, 1]} : vector<8x192xf32> to vector<8x64xf32>
    %164 = math.tanh %162 : vector<8x64xf32>
    %165 = arith.mulf %163, %164 : vector<8x64xf32>
    %166 = vector.extract_strided_slice %165 {offsets = [0, 0], sizes = [8, 32], strides = [1, 1]} : vector<8x64xf32> to vector<8x32xf32>
    %167 = arith.index_cast %141 : i32 to index
    %c0_50 = arith.constant 0 : index
    %168 = vector.load %arg8[%167, %c0_50] : memref<64x64xf32, #tpu.memory_space<vmem>>, vector<8x32xf32>
    tpu.vector_store %arg8[%167, %c0_50], %166 {strides = array<i32>} : memref<64x64xf32, #tpu.memory_space<vmem>>, vector<8x32xf32>,
    %169 = vector.extract_strided_slice %165 {offsets = [0, 32], sizes = [8, 32], strides = [1, 1]} : vector<8x64xf32> to vector<8x32xf32>
    %170 = arith.index_cast %144 : i32 to index
    %c32_51 = arith.constant 32 : index
    %171 = vector.load %arg8[%170, %c32_51] : memref<64x64xf32, #tpu.memory_space<vmem>>, vector<8x32xf32>
    tpu.vector_store %arg8[%170, %c32_51], %169 {strides = array<i32>} : memref<64x64xf32, #tpu.memory_space<vmem>>, vector<8x32xf32>,
    %c5_i32 = arith.constant 5 : i32
    %c8_i32_52 = arith.constant 8 : i32
    %172 = arith.muli %c5_i32, %c8_i32_52 : i32
    %173 = tpu.assume_multiple %172, 8 : i32
    %c7_i32_53 = arith.constant 7 : i32
    %174 = arith.subi %c7_i32_53, %c5_i32 : i32
    %c8_i32_54 = arith.constant 8 : i32
    %175 = arith.muli %174, %c8_i32_54 : i32
    %176 = tpu.assume_multiple %175, 8 : i32
    %177 = arith.index_cast %173 : i32 to index
    %c0_55 = arith.constant 0 : index
    %178 = vector.load %arg7[%177, %c0_55] : memref<64x256xf32, #tpu.memory_space<vmem>>, vector<8x256xf32>
    %179 = arith.truncf %165 : vector<8x64xf32> to vector<8x64xbf16>
    %cst_56 = arith.constant dense<0.000000e+00> : vector<8x256xf32>
    %180 = tpu.matmul %179, %9, %cst_56 {dimension_numbers = #tpu.dot_dimension_numbers<[1], [0], [0], [1], [0, 0, 1, 1], [], []>} : vector<8x64xbf16>, vector<64x256xbf16>, vector<8x256xf32> -> vector<8x256xf32>
    %181 = arith.addf %178, %180 : vector<8x256xf32>
    %182 = vector.extract_strided_slice %181 {offsets = [0, 0], sizes = [8, 192], strides = [1, 1]} : vector<8x256xf32> to vector<8x192xf32>
    %183 = arith.negf %182 : vector<8x192xf32>
    %184 = math.exp %183 : vector<8x192xf32>
    %cst_57 = arith.constant 1.000000e+00 : f32
    %185 = vector.broadcast %cst_57 : f32 to vector<8x192xf32>
    %186 = arith.addf %185, %184 : vector<8x192xf32>
    %187 = arith.divf %185, %186 : vector<8x192xf32>
    %188 = vector.extract_strided_slice %181 {offsets = [0, 192], sizes = [8, 64], strides = [1, 1]} : vector<8x256xf32> to vector<8x64xf32>
    %189 = math.tanh %188 : vector<8x64xf32>
    %190 = vector.extract_strided_slice %187 {offsets = [0, 64], sizes = [8, 64], strides = [1, 1]} : vector<8x192xf32> to vector<8x64xf32>
    %191 = arith.mulf %190, %162 : vector<8x64xf32>
    %192 = vector.extract_strided_slice %187 {offsets = [0, 0], sizes = [8, 64], strides = [1, 1]} : vector<8x192xf32> to vector<8x64xf32>
    %193 = arith.mulf %192, %189 : vector<8x64xf32>
    %194 = arith.addf %191, %193 : vector<8x64xf32>
    %195 = vector.extract_strided_slice %187 {offsets = [0, 128], sizes = [8, 64], strides = [1, 1]} : vector<8x192xf32> to vector<8x64xf32>
    %196 = math.tanh %194 : vector<8x64xf32>
    %197 = arith.mulf %195, %196 : vector<8x64xf32>
    %198 = vector.extract_strided_slice %197 {offsets = [0, 0], sizes = [8, 32], strides = [1, 1]} : vector<8x64xf32> to vector<8x32xf32>
    %199 = arith.index_cast %173 : i32 to index
    %c0_58 = arith.constant 0 : index
    %200 = vector.load %arg8[%199, %c0_58] : memref<64x64xf32, #tpu.memory_space<vmem>>, vector<8x32xf32>
    tpu.vector_store %arg8[%199, %c0_58], %198 {strides = array<i32>} : memref<64x64xf32, #tpu.memory_space<vmem>>, vector<8x32xf32>,
    %201 = vector.extract_strided_slice %197 {offsets = [0, 32], sizes = [8, 32], strides = [1, 1]} : vector<8x64xf32> to vector<8x32xf32>
    %202 = arith.index_cast %176 : i32 to index
    %c32_59 = arith.constant 32 : index
    %203 = vector.load %arg8[%202, %c32_59] : memref<64x64xf32, #tpu.memory_space<vmem>>, vector<8x32xf32>
    tpu.vector_store %arg8[%202, %c32_59], %201 {strides = array<i32>} : memref<64x64xf32, #tpu.memory_space<vmem>>, vector<8x32xf32>,
    %c6_i32 = arith.constant 6 : i32
    %c8_i32_60 = arith.constant 8 : i32
    %204 = arith.muli %c6_i32, %c8_i32_60 : i32
    %205 = tpu.assume_multiple %204, 8 : i32
    %c7_i32_61 = arith.constant 7 : i32
    %206 = arith.subi %c7_i32_61, %c6_i32 : i32
    %c8_i32_62 = arith.constant 8 : i32
    %207 = arith.muli %206, %c8_i32_62 : i32
    %208 = tpu.assume_multiple %207, 8 : i32
    %209 = arith.index_cast %205 : i32 to index
    %c0_63 = arith.constant 0 : index
    %210 = vector.load %arg7[%209, %c0_63] : memref<64x256xf32, #tpu.memory_space<vmem>>, vector<8x256xf32>
    %211 = arith.truncf %197 : vector<8x64xf32> to vector<8x64xbf16>
    %cst_64 = arith.constant dense<0.000000e+00> : vector<8x256xf32>
    %212 = tpu.matmul %211, %9, %cst_64 {dimension_numbers = #tpu.dot_dimension_numbers<[1], [0], [0], [1], [0, 0, 1, 1], [], []>} : vector<8x64xbf16>, vector<64x256xbf16>, vector<8x256xf32> -> vector<8x256xf32>
    %213 = arith.addf %210, %212 : vector<8x256xf32>
    %214 = vector.extract_strided_slice %213 {offsets = [0, 0], sizes = [8, 192], strides = [1, 1]} : vector<8x256xf32> to vector<8x192xf32>
    %215 = arith.negf %214 : vector<8x192xf32>
    %216 = math.exp %215 : vector<8x192xf32>
    %cst_65 = arith.constant 1.000000e+00 : f32
    %217 = vector.broadcast %cst_65 : f32 to vector<8x192xf32>
    %218 = arith.addf %217, %216 : vector<8x192xf32>
    %219 = arith.divf %217, %218 : vector<8x192xf32>
    %220 = vector.extract_strided_slice %213 {offsets = [0, 192], sizes = [8, 64], strides = [1, 1]} : vector<8x256xf32> to vector<8x64xf32>
    %221 = math.tanh %220 : vector<8x64xf32>
    %222 = vector.extract_strided_slice %219 {offsets = [0, 64], sizes = [8, 64], strides = [1, 1]} : vector<8x192xf32> to vector<8x64xf32>
    %223 = arith.mulf %222, %194 : vector<8x64xf32>
    %224 = vector.extract_strided_slice %219 {offsets = [0, 0], sizes = [8, 64], strides = [1, 1]} : vector<8x192xf32> to vector<8x64xf32>
    %225 = arith.mulf %224, %221 : vector<8x64xf32>
    %226 = arith.addf %223, %225 : vector<8x64xf32>
    %227 = vector.extract_strided_slice %219 {offsets = [0, 128], sizes = [8, 64], strides = [1, 1]} : vector<8x192xf32> to vector<8x64xf32>
    %228 = math.tanh %226 : vector<8x64xf32>
    %229 = arith.mulf %227, %228 : vector<8x64xf32>
    %230 = vector.extract_strided_slice %229 {offsets = [0, 0], sizes = [8, 32], strides = [1, 1]} : vector<8x64xf32> to vector<8x32xf32>
    %231 = arith.index_cast %205 : i32 to index
    %c0_66 = arith.constant 0 : index
    %232 = vector.load %arg8[%231, %c0_66] : memref<64x64xf32, #tpu.memory_space<vmem>>, vector<8x32xf32>
    tpu.vector_store %arg8[%231, %c0_66], %230 {strides = array<i32>} : memref<64x64xf32, #tpu.memory_space<vmem>>, vector<8x32xf32>,
    %233 = vector.extract_strided_slice %229 {offsets = [0, 32], sizes = [8, 32], strides = [1, 1]} : vector<8x64xf32> to vector<8x32xf32>
    %234 = arith.index_cast %208 : i32 to index
    %c32_67 = arith.constant 32 : index
    %235 = vector.load %arg8[%234, %c32_67] : memref<64x64xf32, #tpu.memory_space<vmem>>, vector<8x32xf32>
    tpu.vector_store %arg8[%234, %c32_67], %233 {strides = array<i32>} : memref<64x64xf32, #tpu.memory_space<vmem>>, vector<8x32xf32>,
    %c7_i32_68 = arith.constant 7 : i32
    %c8_i32_69 = arith.constant 8 : i32
    %236 = arith.muli %c7_i32_68, %c8_i32_69 : i32
    %237 = tpu.assume_multiple %236, 8 : i32
    %c7_i32_70 = arith.constant 7 : i32
    %238 = arith.subi %c7_i32_70, %c7_i32_68 : i32
    %c8_i32_71 = arith.constant 8 : i32
    %239 = arith.muli %238, %c8_i32_71 : i32
    %240 = tpu.assume_multiple %239, 8 : i32
    %241 = arith.index_cast %237 : i32 to index
    %c0_72 = arith.constant 0 : index
    %242 = vector.load %arg7[%241, %c0_72] : memref<64x256xf32, #tpu.memory_space<vmem>>, vector<8x256xf32>
    %243 = arith.truncf %229 : vector<8x64xf32> to vector<8x64xbf16>
    %cst_73 = arith.constant dense<0.000000e+00> : vector<8x256xf32>
    %244 = tpu.matmul %243, %9, %cst_73 {dimension_numbers = #tpu.dot_dimension_numbers<[1], [0], [0], [1], [0, 0, 1, 1], [], []>} : vector<8x64xbf16>, vector<64x256xbf16>, vector<8x256xf32> -> vector<8x256xf32>
    %245 = arith.addf %242, %244 : vector<8x256xf32>
    %246 = vector.extract_strided_slice %245 {offsets = [0, 0], sizes = [8, 192], strides = [1, 1]} : vector<8x256xf32> to vector<8x192xf32>
    %247 = arith.negf %246 : vector<8x192xf32>
    %248 = math.exp %247 : vector<8x192xf32>
    %cst_74 = arith.constant 1.000000e+00 : f32
    %249 = vector.broadcast %cst_74 : f32 to vector<8x192xf32>
    %250 = arith.addf %249, %248 : vector<8x192xf32>
    %251 = arith.divf %249, %250 : vector<8x192xf32>
    %252 = vector.extract_strided_slice %245 {offsets = [0, 192], sizes = [8, 64], strides = [1, 1]} : vector<8x256xf32> to vector<8x64xf32>
    %253 = math.tanh %252 : vector<8x64xf32>
    %254 = vector.extract_strided_slice %251 {offsets = [0, 64], sizes = [8, 64], strides = [1, 1]} : vector<8x192xf32> to vector<8x64xf32>
    %255 = arith.mulf %254, %226 : vector<8x64xf32>
    %256 = vector.extract_strided_slice %251 {offsets = [0, 0], sizes = [8, 64], strides = [1, 1]} : vector<8x192xf32> to vector<8x64xf32>
    %257 = arith.mulf %256, %253 : vector<8x64xf32>
    %258 = arith.addf %255, %257 : vector<8x64xf32>
    %259 = vector.extract_strided_slice %251 {offsets = [0, 128], sizes = [8, 64], strides = [1, 1]} : vector<8x192xf32> to vector<8x64xf32>
    %260 = math.tanh %258 : vector<8x64xf32>
    %261 = arith.mulf %259, %260 : vector<8x64xf32>
    %262 = vector.extract_strided_slice %261 {offsets = [0, 0], sizes = [8, 32], strides = [1, 1]} : vector<8x64xf32> to vector<8x32xf32>
    %263 = arith.index_cast %237 : i32 to index
    %c0_75 = arith.constant 0 : index
    %264 = vector.load %arg8[%263, %c0_75] : memref<64x64xf32, #tpu.memory_space<vmem>>, vector<8x32xf32>
    tpu.vector_store %arg8[%263, %c0_75], %262 {strides = array<i32>} : memref<64x64xf32, #tpu.memory_space<vmem>>, vector<8x32xf32>,
    %265 = vector.extract_strided_slice %261 {offsets = [0, 32], sizes = [8, 32], strides = [1, 1]} : vector<8x64xf32> to vector<8x32xf32>
    %266 = arith.index_cast %240 : i32 to index
    %c32_76 = arith.constant 32 : index
    %267 = vector.load %arg8[%266, %c32_76] : memref<64x64xf32, #tpu.memory_space<vmem>>, vector<8x32xf32>
    tpu.vector_store %arg8[%266, %c32_76], %265 {strides = array<i32>} : memref<64x64xf32, #tpu.memory_space<vmem>>, vector<8x32xf32>,
    %c8_i32_77 = arith.constant 8 : i32
    %c0_i32_78 = arith.constant 0 : i32
    %c8_i32_79 = arith.constant 8 : i32
    %268 = arith.addi %c0_i32_78, %c8_i32_79 : i32
    %c1_i32_80 = arith.constant 1 : i32
    scf.for %arg9 = %c0_i32_78 to %268 step %c1_i32_80  : i32 {
      %c8_i32_82 = arith.constant 8 : i32
      %269 = arith.muli %arg9, %c8_i32_82 : i32
      %270 = tpu.assume_multiple %269, 8 : i32
      %c0_i32_83 = arith.constant 0 : i32
      %c8_i32_84 = arith.constant 8 : i32
      %271 = arith.addi %c0_i32_83, %c8_i32_84 : i32
      %c1_i32_85 = arith.constant 1 : i32
      scf.for %arg10 = %c0_i32_83 to %271 step %c1_i32_85  : i32 {
        %272 = arith.addi %270, %arg10 : i32
        %273 = arith.index_cast %272 : i32 to index
        %c0_87 = arith.constant 0 : index
        %274 = vector.load %arg8[%273, %c0_87] : memref<64x64xf32, #tpu.memory_space<vmem>>, vector<1x64xf32>
        %c8_i32_88 = arith.constant 8 : i32
        %275 = arith.muli %arg10, %c8_i32_88 : i32
        %276 = arith.addi %275, %arg9 : i32
        %277 = arith.index_cast %276 : i32 to index
        %c0_89 = arith.constant 0 : index
        %278 = vector.load %arg5[%277, %c0_89] : memref<64x64xf32, #tpu.memory_space<vmem>>, vector<1x64xf32>
        tpu.vector_store %arg5[%277, %c0_89], %274 {strides = array<i32>} : memref<64x64xf32, #tpu.memory_space<vmem>>, vector<1x64xf32>,
      }
      %c8_i32_86 = arith.constant 8 : i32
    }
    %c8_i32_81 = arith.constant 8 : i32
    return
  }
}

</mosaic_0001>

<bundles_post_ra>
// kernel: input_encoding_forward.1
= control target key start
LH: loop header
LB: loop body
LE: loop exit
PB: predicated region body
PF: predicated region fallthrough
CT: control target
= control target key end

     0   :  { %10 = vsyncpa [#allocation7], 0  ;;  %s1758_s0 = inlined_call_operand.vmem [shape: s32[64], index: 0, kind: input, shape index: {}]   ;;  %s1759_s1 = inlined_call_operand.vmem [shape: f32[50,32], index: 1, kind: input, shape index: {}]   ;;  %s1760_s2 = inlined_call_operand.vmem [shape: bf16[64,256], index: 2, kind: input, shape index: {}]   ;;  %s1761_s3 = inlined_call_operand.hbm [shape: bf16[64,256], index: 3, kind: input, shape index: {}]   ;;  %s1762_s4 = inlined_call_operand.vmem [shape: f32[1,256], index: 4, kind: input, shape index: {}]   ;;  %s1763_s5 = inlined_call_operand.vmem [shape: f32[64,64], index: 5, kind: output, shape index: {}]  }
   0x1   :  { %s17_s20 = sshll.u32 %s1758_s0, 4  ;;  %s18_s20 = int_to_ptr.vmem [resolvable:$true] %s17_s20 }
   0x2   :  { %11 = vsyncpa [#allocation6], 0  ;;  %s29_s23 = sshll.u32 %s1761_s3, 4  ;;  %s1445_s24 = smov [#allocation5]   ;;  %s30_s23 = int_to_ptr.hbm [resolvable:$true] %s29_s23 }
   0x3   :  { %20 = dma.vmem_to_smem %s18_s20, 16, %s1445_s24, [#allocation7]  }
   0x4   :  { %s1446_s25 = smov [#allocation8]   ;;  %s1447_s27 = smov 128  }
   0x5   :  { %s31_s26 = sshll.u32 %s1446_s25, 4  ;;  %s1448_s28 = smov 8   ;;  %s32_s26 = int_to_ptr.vmem [resolvable:$true] %s31_s26 }
   0x6   :  { %37 = dma.hbm_to_vmem [thread:$0]  %s30_s23, 1024, %s32_s26, [#allocation6], %s1447_s27, %s1447_s27, %s1448_s28  }
   0x7   :  { %1425 = dma.done.wait [#allocation7], 16  }
   0x8   :  { %1426 = vsyncadd [#allocation7], 4294967280 }
   0x9   :  { %1427 = dma.done.wait [#allocation6], 1024  }
   0xa   :  { %1428 = vsyncadd [#allocation6], 4294966272 }
   0xb   :  { %48 = sfence }
   0xc   :  { %s1488_s0 = smov 0  }
   0xd LB: > { %s1116_s3 = sshll.u32 %s1431_s0, 3  ;;  %s57_s29 = ssub.s32 7, %s1431_s0  ;;  %s1431_s0 = sphi %s1488_s0, %s55_s0  }
   0xe   : > { %s1117_s30 = sshll.u32 %s57_s29, 3  ;;  %s1433_s6 = smov 0  }
   0xf LB: >> { %s65_s7 = sadd.s32 %s1435_s6, %s1116_s3  ;;  %vm70_vm0 = vcmask 253952   ;;  %s1449_s13 = smov 32   ;;  %vm78_vm1 = vcmask 516352   ;;  %s1435_s6 = sphi %s1433_s6, %s64_s6  }
  0x10   : >> { %s66_s8 = sld [smem:[#allocation5 + %s65_s7]]  ;;  %s69_s12 = scalar_lea.vmem [#allocation2], %s65_s7 }
  0x11   : >> { %s72_s14 = sadd.s32 %s1435_s6, %s1117_s30  ;;  %s64_s6 = sadd.s32 1, %s1435_s6  }
  0x12   : >> { %s77_s15 = scalar_lea.vmem [#allocation2], %s72_s14  ;;  %p61_p0 = scmp.ge.s32.totalorder %s64_s6, 8  }
  0x13   : > { %s55_s0 = sadd.s32 (%p61_p0), 1, %s1431_s0  }
  0x14   : > { %p52_p1 = scmp.ge.s32.totalorder (%p61_p0), %s55_s0, 8  }
  0x16   : >> { %s67_s11 = scalar_lea.vmem %s1759_s1, %s66_s8 }
  0x17   : >> { %v68_v0 = vld [vmem:[%s67_s11] sm:$0x1] }
  0x18   : >> { %71 = vst.msk [vmem:[%s69_s12] sm:$0x1] %vm70_vm0, %v68_v0  ;;  %74 = vrot.lane.b32.xlu0 %v68_v0, %s1449_s13 }
  0x87   : > { %63 = sbr.rel (!%p61_p0) target bundleno = 15 (0xf), region = 96 }
  0x8a   : >> { %v75_v1 = vpop.permute.xlu0 %74 }
  0x8b   : >> { %79 = vst.msk [vmem:[%s77_s15] sm:$0x1] %vm78_vm1, %v75_v1 }
  0x8c   :  { %54 = sbr.rel (!%p52_p1) target bundleno = 13 (0xd), region = 107  ;;  %v1228_v2 = vld [vmem:[%s1760_s2 + $0x34] sm:$0xf] (%p52_p1)  ;;  %v1146_v3 = vld [vmem:[%s1760_s2 + $0x38] sm:$0xf0] (%p52_p1)  ;;  %vm146_vm2 = vcmask (%p52_p1), 523264  }
  0x8d   :  { %v1236_v4 = vld [vmem:[#allocation8 + $0x34] sm:$0xf] (%p52_p1)  ;;  %v1149_v5 = vor.u32 (%p52_p1), %v1228_v2, %v1146_v3  ;;  %v1186_v6 = vld [vmem:[#allocation8 + $0x38] sm:$0xf0] (%p52_p1)  ;;  %v1226_v7 = vld [vmem:[%s1760_s2 + $0x24] sm:$0xf] (%p52_p1) }
  0x8e   :  { %v1138_v8 = vld [vmem:[%s1760_s2 + $0x28] sm:$0xf0] (%p52_p1)  ;;  %v1508_v9 = vor.u32 (%p52_p1), %v1236_v4, %v1186_v6  ;;  %v1234_v10 = vld [vmem:[#allocation8 + $0x24] sm:$0xf] (%p52_p1)  ;;  %v1224_v14 = vld [vmem:[%s1760_s2 + $0x14] sm:$0xf] (%p52_p1) }
  0x8f   :  { %v1178_v11 = vld [vmem:[#allocation8 + $0x28] sm:$0xf0] (%p52_p1)  ;;  %192 = vmatpush.bf16.msra.mxu1 (%p52_p1), %v1149_v5  ;;  %v1141_v12 = vor.u32 (%p52_p1), %v1226_v7, %v1138_v8  ;;  %v1130_v15 = vld [vmem:[%s1760_s2 + $0x18] sm:$0xf0] (%p52_p1)  ;;  %v1232_v16 = vld [vmem:[#allocation8 + $0x14] sm:$0xf] (%p52_p1) }
  0x90   :  { %306 = vmatpush.bf16.msra.mxu3 (%p52_p1), %v1508_v9  ;;  %v1511_v13 = vor.u32 (%p52_p1), %v1234_v10, %v1178_v11  ;;  %v1170_v17 = vld [vmem:[#allocation8 + $0x18] sm:$0xf0] (%p52_p1)  ;;  %v1222_v18 = vld [vmem:[%s1760_s2 + $0x4] sm:$0xf] (%p52_p1)  ;;  %v1184_v19 = vld [vmem:[#allocation8 + $0x30] sm:$0xf] (%p52_p1)  ;;  %v1133_v22 = vor.u32 (%p52_p1), %v1224_v14, %v1130_v15 }
  0x91   :  { %v1237_v20 = vld [vmem:[#allocation8 + $0x34] sm:$0xf0]  ;;  %v1144_v21 = vld [vmem:[%s1760_s2 + $0x30] sm:$0xf]  ;;  %v1176_v25 = vld [vmem:[#allocation8 + $0x20] sm:$0xf]  ;;  %v1531_v27 = vor.u32 %v1232_v16, %v1170_v17 }
  0x92   :  { %v1525_v23 = vor.u32 %v1237_v20, %v1184_v19  ;;  %v1229_v24 = vld [vmem:[%s1760_s2 + $0x34] sm:$0xf0]  ;;  %v1235_v26 = vld [vmem:[#allocation8 + $0x24] sm:$0xf0]  ;;  %v1122_v28 = vld [vmem:[%s1760_s2 + $0x8] sm:$0xf0] }
  0x93   :  { %193 = vmatpush.bf16.msra.mxu1 %v1141_v12  ;;  %v1145_v29 = vor.u32 %v1229_v24, %v1144_v21  ;;  %v1136_v30 = vld [vmem:[%s1760_s2 + $0x20] sm:$0xf]  ;;  %v1227_v31 = vld [vmem:[%s1760_s2 + $0x24] sm:$0xf0]  ;;  %v1230_v32 = vld [vmem:[#allocation8 + $0x4] sm:$0xf]  ;;  %v1543_v34 = vor.u32 %v1235_v26, %v1176_v25  ;;  %v1125_v39 = vor.u32 %v1222_v18, %v1122_v28 }
  0x94   :  { %307 = vmatpush.bf16.msra.mxu3 %v1511_v13  ;;  %v1162_v33 = vld [vmem:[#allocation8 + $0x8] sm:$0xf0]  ;;  %293 = vmatpush.bf16.msra.mxu2 %v1525_v23  ;;  %v80_v35 = vld [vmem:[#allocation2] sm:$0xff]  ;;  %v1137_v36 = vor.u32 %v1227_v31, %v1136_v30  ;;  %v1168_v37 = vld [vmem:[#allocation8 + $0x10] sm:$0xf]  ;;  %v1450_v53 = vmov 0  }
  0x95   :  { %163 = vmatpush.bf16.msra.mxu0 %v1145_v29  ;;  %v1233_v38 = vld [vmem:[#allocation8 + $0x14] sm:$0xf0]  ;;  %v81_v40 = vld [vmem:[#allocation2 + $0x8] sm:$0xff]  ;;  %v1128_v41 = vld [vmem:[%s1760_s2 + $0x10] sm:$0xf]  ;;  %v1552_v43 = vor.u32 %v1230_v32, %v1162_v33  ;;  %s1451_s21 = smov 64  }
  0x96   :  { %v1225_v42 = vld [vmem:[%s1760_s2 + $0x14] sm:$0xf0]  ;;  %v1555_v44 = vor.u32 %v1233_v38, %v1168_v37  ;;  %v88_v45 = vpack.c.bf16 %v81_v40, %v80_v35  ;;  %v1160_v47 = vld [vmem:[#allocation8] sm:$0xf]  ;;  %v1231_v48 = vld [vmem:[#allocation8 + $0x4] sm:$0xf0] }
  0x97   :  { %194 = vmatpush.bf16.msra.mxu1 %v1133_v22  ;;  %v1129_v46 = vor.u32 %v1225_v42, %v1128_v41  ;;  %v1120_v49 = vld [vmem:[%s1760_s2] sm:$0xf]  ;;  %v1223_v50 = vld [vmem:[%s1760_s2 + $0x4] sm:$0xf0]  ;;  %v1566_v51 = vor.u32 %v1231_v48, %v1160_v47  ;;  %vm373_vm11 = vcmask 261120   ;;  %vm376_vm12 = vcmask 523520  }
  0x98   :  { %308 = vmatpush.bf16.msra.mxu3 %v1531_v27  ;;  %294 = vmatpush.bf16.msra.mxu2 %v1543_v34  ;;  %v1121_v52 = vor.u32 %v1223_v50, %v1120_v49  ;;  %v100_v54 = vld [vmem:[%s1762_s4] sm:$0x3]  ;;  %s1437_s4 = smov 0  }
  0x99   :  { %164 = vmatpush.bf16.msra.mxu0 %v1137_v36  ;;  %v1605_v55 = vperm.slane %v100_v54, 1  ;;  %v1609_v0 = vperm.slane %v100_v54, 0 }
  0x9b   :  { %195 = vmatpush.bf16.msra.mxu1 %v1125_v39 }
  0x9c   :  { %309 = vmatpush.bf16.msra.mxu3 %v1552_v43  ;;  %295 = vmatpush.bf16.msra.mxu2 %v1555_v44 }
  0x9d   :  { %165 = vmatpush.bf16.msra.mxu0 %v1129_v46 }
  0x9e   :  { %1154 = vmatmul.msk.bf16.vlgmr.msra.gmra.mxu1 %vm146_vm2, %v88_v45 }
  0x9f   :  { %695 = vmatpush.bf16.msrb.mxu1 %v1508_v9  ;;  %310 = vmatmul.bf16.vlgmr.msra.gmra.mxu3 %v1450_v53 }
  0xa0   :  { %404 = vmatpush.bf16.msrb.mxu3 %v1508_v9  ;;  %296 = vmatpush.bf16.msra.mxu2 %v1566_v51 }
  0xa1   :  { %166 = vmatpush.bf16.msra.mxu0 %v1121_v52 }
  0xa3   :  { %696 = vmatpush.bf16.msrb.mxu1 %v1511_v13  ;;  %297 = vmatmul.bf16.vlgmr.msra.gmra.mxu2 %v1450_v53 }
  0xa4   :  { %405 = vmatpush.bf16.msrb.mxu3 %v1511_v13  ;;  %391 = vmatpush.bf16.msrb.mxu2 %v1525_v23 }
  0xa5   :  { %682 = vmatpush.bf16.msrb.mxu0 %v1525_v23 }
  0xa6   :  { %1150 = vmatmul.msk.bf16.vlgmr.msra.gmra.mxu0 %vm146_vm2, %v88_v45 }
  0xa7   :  { %697 = vmatpush.bf16.msrb.mxu1 %v1531_v27 }
  0xa8   :  { %406 = vmatpush.bf16.msrb.mxu3 %v1531_v27  ;;  %392 = vmatpush.bf16.msrb.mxu2 %v1543_v34 }
  0xa9   :  { %683 = vmatpush.bf16.msrb.mxu0 %v1543_v34 }
  0xab   :  { %698 = vmatpush.bf16.msrb.mxu1 %v1552_v43 }
  0xac   :  { %407 = vmatpush.bf16.msrb.mxu3 %v1552_v43  ;;  %393 = vmatpush.bf16.msrb.mxu2 %v1555_v44 }
  0xad   :  { %684 = vmatpush.bf16.msrb.mxu0 %v1555_v44 }
  0xaf   :  { %885 = vmatpush.bf16.msra.mxu1 %v1508_v9 }
  0xb0   :  { %501 = vmatpush.bf16.msra.mxu3 %v1508_v9  ;;  %394 = vmatpush.bf16.msrb.mxu2 %v1566_v51 }
  0xb1   :  { %685 = vmatpush.bf16.msrb.mxu0 %v1566_v51 }
  0xb3   :  { %886 = vmatpush.bf16.msra.mxu1 %v1511_v13 }
  0xb4   :  { %502 = vmatpush.bf16.msra.mxu3 %v1511_v13  ;;  %488 = vmatpush.bf16.msra.mxu2 %v1525_v23 }
  0xb5   :  { %872 = vmatpush.bf16.msra.mxu0 %v1525_v23 }
  0xb7   :  { %887 = vmatpush.bf16.msra.mxu1 %v1531_v27 }
  0xb8   :  { %503 = vmatpush.bf16.msra.mxu3 %v1531_v27  ;;  %489 = vmatpush.bf16.msra.mxu2 %v1543_v34 }
  0xb9   :  { %873 = vmatpush.bf16.msra.mxu0 %v1543_v34 }
  0xbb   :  { %888 = vmatpush.bf16.msra.mxu1 %v1552_v43 }
  0xbc   :  { %504 = vmatpush.bf16.msra.mxu3 %v1552_v43  ;;  %490 = vmatpush.bf16.msra.mxu2 %v1555_v44 }
  0xbd   :  { %874 = vmatpush.bf16.msra.mxu0 %v1555_v44 }
  0xc0   :  { %491 = vmatpush.bf16.msra.mxu2 %v1566_v51 }
  0xc1   :  { %875 = vmatpush.bf16.msra.mxu0 %v1566_v51 }
 0x11b   :  { %v197_v56 = vpop.f32.mrf.mxu1 }
 0x11c   :  { %v198_v57 = vadd.f32 %v197_v56, %v1605_v55 }
 0x122   :  { %v311_v58 = vpop.f32.mrf.mxu3 }
 0x123   :  { %v316_v59 = vadd.f32 %v311_v58, %v198_v57  ;;  %v168_v1 = vpop.f32.mrf.mxu0  ;;  %v199_v46 = vpop.f32.mrf.mxu1 }
 0x124   :  { %v169_v2 = vadd.f32 %v168_v1, %v1609_v0  ;;  %v200_v47 = vadd.f32 %v199_v46, %v1605_v55 }
 0x125   :  { %1277 = vtanh.f32 %v316_v59  ;;  %v1191_v26 = vmul.f32 -1.442695, %v316_v59 }
 0x126   :  { %v298_v60 = vpop.f32.mrf.mxu2 }
 0x127   :  { %v315_v3 = vadd.f32 %v298_v60, %v169_v2 }
 0x129   :  { %v1190_v4 = vmul.f32 -1.442695, %v315_v3 }
 0x12a   :  { %v313_v61 = vpop.f32.mrf.mxu3 }
 0x12b   :  { %v1278_v62 = vpop.eup %1277  ;;  %1279 = vpow2.f32 %v1190_v4  ;;  %v170_v56 = vpop.f32.mrf.mxu0 }
 0x12c   :  { %358 = vrot.lane.b32.xlu0 %v1278_v62, %s1451_s21  ;;  %v171_v57 = vadd.f32 %v170_v56, %v1609_v0 }
 0x12e   :  { %v300_v63 = vpop.f32.mrf.mxu2 }
 0x131   :  { %v1280_v5 = vpop.eup %1279 }
 0x132   :  { %v323_v6 = vadd.f32 1.0, %v1280_v5 }
 0x134   :  { %1281 = vrcp.f32 %v323_v6  ;;  %vm330_vm3 = vweird.f32 %v323_v6  ;;  %v336_v12 = vand.u32 2147483648, %v323_v6  ;;  %v334_v15 = vand.u32 2147483647, %v323_v6 }
 0x136   :  { %v337_v16 = vor.u32 1.1754944e-38, %v336_v12  ;;  %vm335_vm6 = vcmp.eq.f32.partialorder %v334_v15, 8.507059e+37 }
 0x13a   :  { %v1282_v7 = vpop.eup %1281 }
 0x13b   :  { %v326_v8 = vmul.f32 %v1282_v7, %v323_v6  ;;  %vm331_vm4 = vweird.f32 %v1282_v7 }
 0x13c   :  { %vm332_vm5 = vmor %vm330_vm3, %vm331_vm4 }
 0x13d   :  { %v327_v10 = vsub.f32 1.0, %v326_v8 }
 0x13f   :  { %v328_v11 = vmul.f32 %v1282_v7, %v327_v10 }
 0x141   :  { %v329_v14 = vadd.f32 %v1282_v7, %v328_v11 }
 0x143   :  { %v333_v17 = vsel %vm332_vm5, %v1282_v7, %v329_v14 }
 0x144   :  { %v338_v19 = vsel %vm335_vm6, %v337_v16, %v333_v17 }
 0x145   :  { %v356_v21 = vmul.f32 0.0, %v338_v19 }
 0x19e   :  { %v359_v18 = vpop.permute.xlu0 %358 }
 0x19f   :  { %v361_v20 = vmul.f32 %v359_v18, %v338_v19  ;;  %v82_v19 = vld [vmem:[#allocation2 + $0x10] sm:$0xff] }
 0x1a1   :  { %363 = vrot.lane.b32.xlu0 %v361_v20, %s1451_s21  ;;  %v83_v20 = vld [vmem:[#allocation2 + $0x18] sm:$0xff] }
 0x213   :  { %v364_v22 = vpop.permute.xlu0 %363 }
 0x214   :  { %v1613_v24 = vadd.f32 %v364_v22, %v356_v21  ;;  %v89_v22 = vpack.c.bf16 %v83_v20, %v82_v19 }
 0x216   :  { %1283 = vtanh.f32 %v1613_v24  ;;  %1155 = vmatmul.msk.bf16.gmra.mxu1 %vm146_vm2, %v89_v22  ;;  %1151 = vmatmul.msk.bf16.gmra.mxu0 %vm146_vm2, %v89_v22 }
 0x217   :  { %1285 = vpow2.f32 %v1191_v26 }
 0x21c   :  { %v1284_v25 = vpop.eup %1283 }
 0x21d   :  { %369 = vrot.lane.b32.xlu1 %v1284_v25, %s1451_s21  ;;  %v1286_v28 = vpop.eup %1285 }
 0x21e   :  { %v324_v29 = vadd.f32 1.0, %v1286_v28 }
 0x220   :  { %1287 = vrcp.f32 %v324_v29  ;;  %v351_v36 = vand.u32 2147483648, %v324_v29  ;;  %vm345_vm8 = vweird.f32 %v324_v29  ;;  %v349_v37 = vand.u32 2147483647, %v324_v29 }
 0x222   :  { %v352_v39 = vor.u32 1.1754944e-38, %v351_v36  ;;  %vm350_vm10 = vcmp.eq.f32.partialorder %v349_v37, 8.507059e+37 }
 0x226   :  { %v1288_v30 = vpop.eup %1287 }
 0x227   :  { %v341_v31 = vmul.f32 %v1288_v30, %v324_v29  ;;  %vm346_vm7 = vweird.f32 %v1288_v30 }
 0x228   :  { %vm347_vm9 = vmor %vm345_vm8, %vm346_vm7 }
 0x229   :  { %v342_v32 = vsub.f32 1.0, %v341_v31 }
 0x22b   :  { %v343_v33 = vmul.f32 %v1288_v30, %v342_v32 }
 0x22d   :  { %v344_v35 = vadd.f32 %v1288_v30, %v343_v33 }
 0x22f   :  { %v348_v38 = vsel %vm347_vm9, %v1288_v30, %v344_v35 }
 0x230   :  { %v353_v40 = vsel %vm350_vm10, %v352_v39, %v348_v38 }
 0x28f   :  { %v370_v41 = vpop.permute.xlu1 %369 }
 0x290   :  { %v372_v42 = vmul.f32 %v370_v41, %v353_v40 }
 0x292   :  { %374 = vst.msk [vmem:[#allocation4] sm:$0xff] %vm373_vm11, %v372_v42  ;;  %v383_v45 = vpack.c.bf16 %v372_v42, %v372_v42 }
 0x293   :  { %377 = vst.msk [vmem:[#allocation4 + $0x38] sm:$0xff] %vm376_vm12, %v372_v42  ;;  %v202_v39 = vpop.f32.mrf.mxu1 }
 0x294   :  { %1192 = vmatmul.msk.bf16.vlgmr.msrb.gmra.mxu2 %vm146_vm2, %v383_v45  ;;  %1193 = vmatmul.msk.bf16.vlgmr.msrb.gmra.mxu3 %vm146_vm2, %v383_v45  ;;  %v203_v40 = vadd.f32 %v202_v39, %v1605_v55 }
 0x295   :  { %598 = vmatpush.bf16.msrb.mxu3 %v1508_v9  ;;  %585 = vmatpush.bf16.msrb.mxu2 %v1525_v23 }
 0x299   :  { %599 = vmatpush.bf16.msrb.mxu3 %v1511_v13  ;;  %586 = vmatpush.bf16.msrb.mxu2 %v1543_v34 }
 0x29d   :  { %600 = vmatpush.bf16.msrb.mxu3 %v1531_v27  ;;  %587 = vmatpush.bf16.msrb.mxu2 %v1555_v44 }
 0x2a1   :  { %601 = vmatpush.bf16.msrb.mxu3 %v1552_v43  ;;  %588 = vmatpush.bf16.msrb.mxu2 %v1566_v51 }
 0x317   :  { %v396_v48 = vpop.f32.mrf.mxu2  ;;  %v409_v49 = vpop.f32.mrf.mxu3 }
 0x318   :  { %v414_v50 = vadd.f32 %v409_v49, %v200_v47  ;;  %v413_v58 = vadd.f32 %v396_v48, %v171_v57  ;;  %v173_v49 = vpop.f32.mrf.mxu0 }
 0x31a   :  { %1289 = vtanh.f32 %v414_v50  ;;  %v1194_v59 = vmul.f32 -1.442695, %v413_v58  ;;  %v1195_v17 = vmul.f32 -1.442695, %v414_v50  ;;  %v174_v50 = vadd.f32 %v173_v49, %v1609_v0 }
 0x31c   :  { %1291 = vpow2.f32 %v1194_v59 }
 0x31f   :  { %v398_v52 = vpop.f32.mrf.mxu2  ;;  %v411_v53 = vpop.f32.mrf.mxu3 }
 0x320   :  { %v1290_v54 = vpop.eup %1289 }
 0x321   :  { %456 = vrot.lane.b32.xlu1 %v1290_v54, %s1451_s21 }
 0x322   :  { %v1292_v60 = vpop.eup %1291 }
 0x323   :  { %v421_v61 = vadd.f32 1.0, %v1292_v60 }
 0x325   :  { %1293 = vrcp.f32 %v421_v61  ;;  %v434_v4 = vand.u32 2147483648, %v421_v61  ;;  %vm428_vm14 = vweird.f32 %v421_v61  ;;  %v432_v5 = vand.u32 2147483647, %v421_v61 }
 0x327   :  { %v435_v7 = vor.u32 1.1754944e-38, %v434_v4  ;;  %vm433_vm0 = vcmp.eq.f32.partialorder %v432_v5, 8.507059e+37 }
 0x32b   :  { %v1294_v62 = vpop.eup %1293 }
 0x32c   :  { %v424_v63 = vmul.f32 %v1294_v62, %v421_v61  ;;  %vm429_vm13 = vweird.f32 %v1294_v62 }
 0x32d   :  { %vm430_vm15 = vmor %vm428_vm14, %vm429_vm13 }
 0x32e   :  { %v425_v1 = vsub.f32 1.0, %v424_v63 }
 0x330   :  { %v426_v2 = vmul.f32 %v1294_v62, %v425_v1 }
 0x332   :  { %v427_v3 = vadd.f32 %v1294_v62, %v426_v2 }
 0x334   :  { %v431_v6 = vsel %vm430_vm15, %v1294_v62, %v427_v3 }
 0x335   :  { %v436_v10 = vsel %vm433_vm0, %v435_v7, %v431_v6 }
 0x336   :  { %v454_v12 = vmul.f32 %v436_v10, %v1613_v24 }
 0x393   :  { %v457_v8 = vpop.permute.xlu1 %456 }
 0x394   :  { %v459_v11 = vmul.f32 %v457_v8, %v436_v10 }
 0x396   :  { %461 = vrot.lane.b32.xlu2 %v459_v11, %s1451_s21 }
 0x3f0   :  { %v462_v14 = vpop.permute.xlu2 %461 }
 0x3f1   :  { %v1634_v15 = vadd.f32 %v462_v14, %v454_v12 }
 0x3f3   :  { %1295 = vtanh.f32 %v1634_v15 }
 0x3f4   :  { %1297 = vpow2.f32 %v1195_v17 }
 0x3f9   :  { %v1296_v16 = vpop.eup %1295 }
 0x3fa   :  { %467 = vrot.lane.b32.xlu2 %v1296_v16, %s1451_s21  ;;  %v1298_v18 = vpop.eup %1297 }
 0x3fb   :  { %v422_v21 = vadd.f32 1.0, %v1298_v18 }
 0x3fd   :  { %1299 = vrcp.f32 %v422_v21  ;;  %v449_v30 = vand.u32 2147483648, %v422_v21  ;;  %vm443_vm3 = vweird.f32 %v422_v21  ;;  %v447_v31 = vand.u32 2147483647, %v422_v21 }
 0x3ff   :  { %v450_v33 = vor.u32 1.1754944e-38, %v449_v30  ;;  %vm448_vm5 = vcmp.eq.f32.partialorder %v447_v31, 8.507059e+37  ;;  %v204_v30 = vpop.f32.mrf.mxu1 }
 0x400   :  { %v205_v31 = vadd.f32 %v204_v30, %v1605_v55 }
 0x403   :  { %v1300_v24 = vpop.eup %1299 }
 0x404   :  { %v439_v25 = vmul.f32 %v1300_v24, %v422_v21  ;;  %vm444_vm1 = vweird.f32 %v1300_v24 }
 0x405   :  { %vm445_vm4 = vmor %vm443_vm3, %vm444_vm1 }
 0x406   :  { %v440_v26 = vsub.f32 1.0, %v439_v25 }
 0x408   :  { %v441_v28 = vmul.f32 %v1300_v24, %v440_v26 }
 0x40a   :  { %v442_v29 = vadd.f32 %v1300_v24, %v441_v28 }
 0x40c   :  { %v446_v32 = vsel %vm445_vm4, %v1300_v24, %v442_v29 }
 0x40d   :  { %v451_v35 = vsel %vm448_vm5, %v450_v33, %v446_v32 }
 0x454   :  { %v468_v36 = vpop.permute.xlu2 %467 }
 0x455   :  { %v470_v37 = vmul.f32 %v468_v36, %v451_v35 }
 0x457   :  { %472 = vst.msk [vmem:[#allocation4 + $0x8] sm:$0xff] %vm373_vm11, %v470_v37  ;;  %v480_v38 = vpack.c.bf16 %v470_v37, %v470_v37 }
 0x458   :  { %474 = vst.msk [vmem:[#allocation4 + $0x30] sm:$0xff] %vm376_vm12, %v470_v37 }
 0x459   :  { %1196 = vmatmul.msk.bf16.vlgmr.msra.gmra.mxu2 %vm146_vm2, %v480_v38  ;;  %1197 = vmatmul.msk.bf16.vlgmr.msra.gmra.mxu3 %vm146_vm2, %v480_v38 }
 0x45a   :  { %790 = vmatpush.bf16.msra.mxu3 %v1508_v9  ;;  %777 = vmatpush.bf16.msra.mxu2 %v1525_v23 }
 0x45e   :  { %791 = vmatpush.bf16.msra.mxu3 %v1511_v13  ;;  %778 = vmatpush.bf16.msra.mxu2 %v1543_v34 }
 0x462   :  { %792 = vmatpush.bf16.msra.mxu3 %v1531_v27  ;;  %779 = vmatpush.bf16.msra.mxu2 %v1555_v44 }
 0x466   :  { %793 = vmatpush.bf16.msra.mxu3 %v1552_v43  ;;  %780 = vmatpush.bf16.msra.mxu2 %v1566_v51 }
 0x4dc   :  { %v493_v41 = vpop.f32.mrf.mxu2  ;;  %v506_v42 = vpop.f32.mrf.mxu3 }
 0x4dd   :  { %v511_v45 = vadd.f32 %v506_v42, %v203_v40  ;;  %v510_v52 = vadd.f32 %v493_v41, %v174_v50 }
 0x4df   :  { %1301 = vtanh.f32 %v511_v45  ;;  %v1198_v53 = vmul.f32 -1.442695, %v510_v52  ;;  %v1199_v11 = vmul.f32 -1.442695, %v511_v45  ;;  %v84_v52 = vld [vmem:[#allocation2 + $0x20] sm:$0xff] }
 0x4e1   :  { %1303 = vpow2.f32 %v1198_v53  ;;  %v85_v53 = vld [vmem:[#allocation2 + $0x28] sm:$0xff] }
 0x4e4   :  { %v495_v46 = vpop.f32.mrf.mxu2  ;;  %v508_v47 = vpop.f32.mrf.mxu3 }
 0x4e5   :  { %v1302_v48 = vpop.eup %1301 }
 0x4e6   :  { %553 = vrot.lane.b32.xlu0 %v1302_v48, %s1451_s21 }
 0x4e7   :  { %v1304_v54 = vpop.eup %1303 }
 0x4e8   :  { %v518_v56 = vadd.f32 1.0, %v1304_v54  ;;  %v90_v54 = vpack.c.bf16 %v85_v53, %v84_v52 }
 0x4ea   :  { %1305 = vrcp.f32 %v518_v56  ;;  %v531_v62 = vand.u32 2147483648, %v518_v56  ;;  %vm525_vm7 = vweird.f32 %v518_v56  ;;  %v529_v63 = vand.u32 2147483647, %v518_v56  ;;  %1156 = vmatmul.msk.bf16.gmra.mxu1 %vm146_vm2, %v90_v54  ;;  %1152 = vmatmul.msk.bf16.gmra.mxu0 %vm146_vm2, %v90_v54 }
 0x4ec   :  { %v532_v2 = vor.u32 1.1754944e-38, %v531_v62  ;;  %vm530_vm9 = vcmp.eq.f32.partialorder %v529_v63, 8.507059e+37 }
 0x4f0   :  { %v1306_v57 = vpop.eup %1305 }
 0x4f1   :  { %v521_v58 = vmul.f32 %v1306_v57, %v518_v56  ;;  %vm526_vm6 = vweird.f32 %v1306_v57  ;;  %v86_v56 = vld [vmem:[#allocation2 + $0x30] sm:$0xff] }
 0x4f2   :  { %vm527_vm8 = vmor %vm525_vm7, %vm526_vm6 }
 0x4f3   :  { %v522_v59 = vsub.f32 1.0, %v521_v58 }
 0x4f5   :  { %v523_v60 = vmul.f32 %v1306_v57, %v522_v59 }
 0x4f7   :  { %v524_v61 = vadd.f32 %v1306_v57, %v523_v60 }
 0x4f9   :  { %v528_v1 = vsel %vm527_vm8, %v1306_v57, %v524_v61  ;;  %v87_v57 = vld [vmem:[#allocation2 + $0x38] sm:$0xff] }
 0x4fa   :  { %v533_v4 = vsel %vm530_vm9, %v532_v2, %v528_v1  ;;  %v91_v58 = vpack.c.bf16 %v87_v57, %v86_v56 }
 0x4fb   :  { %v551_v6 = vmul.f32 %v533_v4, %v1634_v15 }
 0x4fc   :  { %1157 = vmatmul.msk.bf16.gmra.mxu1 %vm146_vm2, %v91_v58  ;;  %1153 = vmatmul.msk.bf16.gmra.mxu0 %vm146_vm2, %v91_v58 }
 0x558   :  { %v554_v3 = vpop.permute.xlu0 %553 }
 0x559   :  { %v556_v5 = vmul.f32 %v554_v3, %v533_v4 }
 0x55b   :  { %558 = vrot.lane.b32.xlu1 %v556_v5, %s1451_s21 }
 0x5cd   :  { %v559_v7 = vpop.permute.xlu1 %558 }
 0x5ce   :  { %v1657_v8 = vadd.f32 %v559_v7, %v551_v6 }
 0x5d0   :  { %1307 = vtanh.f32 %v1657_v8 }
 0x5d1   :  { %1309 = vpow2.f32 %v1199_v11 }
 0x5d6   :  { %v1308_v10 = vpop.eup %1307 }
 0x5d7   :  { %564 = vrot.lane.b32.xlu2 %v1308_v10, %s1451_s21  ;;  %v1310_v12 = vpop.eup %1309 }
 0x5d8   :  { %v519_v14 = vadd.f32 1.0, %v1310_v12 }
 0x5da   :  { %1311 = vrcp.f32 %v519_v14  ;;  %v546_v15 = vand.u32 2147483648, %v519_v14  ;;  %vm540_vm13 = vweird.f32 %v519_v14  ;;  %v544_v21 = vand.u32 2147483647, %v519_v14 }
 0x5dc   :  { %v547_v24 = vor.u32 1.1754944e-38, %v546_v15  ;;  %vm545_vm15 = vcmp.eq.f32.partialorder %v544_v21, 8.507059e+37 }
 0x5e0   :  { %v1312_v16 = vpop.eup %1311 }
 0x5e1   :  { %v536_v17 = vmul.f32 %v1312_v16, %v519_v14  ;;  %vm541_vm10 = vweird.f32 %v1312_v16 }
 0x5e2   :  { %vm542_vm14 = vmor %vm540_vm13, %vm541_vm10 }
 0x5e3   :  { %v537_v18 = vsub.f32 1.0, %v536_v17 }
 0x5e5   :  { %v538_v19 = vmul.f32 %v1312_v16, %v537_v18 }
 0x5e7   :  { %v539_v20 = vadd.f32 %v1312_v16, %v538_v19 }
 0x5e9   :  { %v543_v22 = vsel %vm542_vm14, %v1312_v16, %v539_v20  ;;  %v207_v20 = vpop.f32.mrf.mxu1 }
 0x5ea   :  { %v548_v25 = vsel %vm545_vm15, %v547_v24, %v543_v22 }
 0x5f1   :  { %v1692_v21 = vpop.f32.mrf.mxu1 }
 0x5f9   :  { %v1696_v24 = vpop.f32.mrf.mxu1 }
 0x631   :  { %v565_v26 = vpop.permute.xlu2 %564 }
 0x632   :  { %v567_v28 = vmul.f32 %v565_v26, %v548_v25  ;;  %v1700_v26 = vpop.f32.mrf.mxu1 }
 0x634   :  { %569 = vst.msk [vmem:[#allocation4 + $0x10] sm:$0xff] %vm373_vm11, %v567_v28  ;;  %v577_v29 = vpack.c.bf16 %v567_v28, %v567_v28 }
 0x635   :  { %571 = vst.msk [vmem:[#allocation4 + $0x28] sm:$0xff] %vm376_vm12, %v567_v28 }
 0x636   :  { %1200 = vmatmul.msk.bf16.vlgmr.msrb.gmra.mxu2 %vm146_vm2, %v577_v29  ;;  %1201 = vmatmul.msk.bf16.vlgmr.msrb.gmra.mxu3 %vm146_vm2, %v577_v29  ;;  %v208_v29 = vadd.f32 %v207_v20, %v1605_v55 }
 0x637   :  { %980 = vmatpush.bf16.msrb.mxu3 %v1508_v9  ;;  %967 = vmatpush.bf16.msrb.mxu2 %v1525_v23 }
 0x63b   :  { %981 = vmatpush.bf16.msrb.mxu3 %v1511_v13  ;;  %968 = vmatpush.bf16.msrb.mxu2 %v1543_v34  ;;  %v175_v34 = vpop.f32.mrf.mxu0 }
 0x63f   :  { %982 = vmatpush.bf16.msrb.mxu3 %v1531_v27  ;;  %969 = vmatpush.bf16.msrb.mxu2 %v1555_v44  ;;  %v176_v27 = vadd.f32 %v175_v34, %v1609_v0 }
 0x643   :  { %983 = vmatpush.bf16.msrb.mxu3 %v1552_v43  ;;  %970 = vmatpush.bf16.msrb.mxu2 %v1566_v51  ;;  %v178_v19 = vpop.f32.mrf.mxu0 }
 0x644   :  { %v179_v28 = vadd.f32 %v178_v19, %v1609_v0 }
 0x64b   :  { %v1690_v15 = vpop.f32.mrf.mxu0 }
 0x653   :  { %v1694_v22 = vpop.f32.mrf.mxu0 }
 0x65b   :  { %v1698_v25 = vpop.f32.mrf.mxu0 }
 0x6b9   :  { %v590_v32 = vpop.f32.mrf.mxu2  ;;  %v603_v33 = vpop.f32.mrf.mxu3 }
 0x6ba   :  { %v608_v9 = vadd.f32 %v603_v33, %v205_v31  ;;  %v607_v44 = vadd.f32 %v590_v32, %v176_v27 }
 0x6bc   :  { %1313 = vtanh.f32 %v608_v9  ;;  %v1202_v36 = vmul.f32 -1.442695, %v607_v44  ;;  %v1203_v63 = vmul.f32 -1.442695, %v608_v9 }
 0x6be   :  { %1315 = vpow2.f32 %v1202_v36 }
 0x6c1   :  { %v592_v23 = vpop.f32.mrf.mxu2  ;;  %v605_v35 = vpop.f32.mrf.mxu3 }
 0x6c2   :  { %v1314_v13 = vpop.eup %1313 }
 0x6c3   :  { %650 = vrot.lane.b32.xlu0 %v1314_v13, %s1451_s21 }
 0x6c4   :  { %v1316_v43 = vpop.eup %1315 }
 0x6c5   :  { %v615_v51 = vadd.f32 1.0, %v1316_v43 }
 0x6c7   :  { %1317 = vrcp.f32 %v615_v51  ;;  %v628_v42 = vand.u32 2147483648, %v615_v51  ;;  %vm622_vm1 = vweird.f32 %v615_v51  ;;  %v626_v45 = vand.u32 2147483647, %v615_v51 }
 0x6c9   :  { %v629_v47 = vor.u32 1.1754944e-38, %v628_v42  ;;  %vm627_vm4 = vcmp.eq.f32.partialorder %v626_v45, 8.507059e+37 }
 0x6cd   :  { %v1318_v37 = vpop.eup %1317 }
 0x6ce   :  { %v618_v38 = vmul.f32 %v1318_v37, %v615_v51  ;;  %vm623_vm0 = vweird.f32 %v1318_v37 }
 0x6cf   :  { %vm624_vm3 = vmor %vm622_vm1, %vm623_vm0 }
 0x6d0   :  { %v619_v39 = vsub.f32 1.0, %v618_v38 }
 0x6d2   :  { %v620_v40 = vmul.f32 %v1318_v37, %v619_v39 }
 0x6d4   :  { %v621_v41 = vadd.f32 %v1318_v37, %v620_v40 }
 0x6d6   :  { %v625_v46 = vsel %vm624_vm3, %v1318_v37, %v621_v41 }
 0x6d7   :  { %v630_v49 = vsel %vm627_vm4, %v629_v47, %v625_v46 }
 0x6d8   :  { %v648_v59 = vmul.f32 %v630_v49, %v1657_v8 }
 0x735   :  { %v651_v48 = vpop.permute.xlu0 %650 }
 0x736   :  { %v653_v50 = vmul.f32 %v651_v48, %v630_v49 }
 0x738   :  { %655 = vrot.lane.b32.xlu1 %v653_v50, %s1451_s21 }
 0x7aa   :  { %v656_v60 = vpop.permute.xlu1 %655 }
 0x7ab   :  { %v1682_v61 = vadd.f32 %v656_v60, %v648_v59 }
 0x7ad   :  { %1319 = vtanh.f32 %v1682_v61 }
 0x7ae   :  { %1321 = vpow2.f32 %v1203_v63 }
 0x7b3   :  { %v1320_v62 = vpop.eup %1319 }
 0x7b4   :  { %661 = vrot.lane.b32.xlu2 %v1320_v62, %s1451_s21  ;;  %v1322_v1 = vpop.eup %1321 }
 0x7b5   :  { %v616_v2 = vadd.f32 1.0, %v1322_v1 }
 0x7b7   :  { %1323 = vrcp.f32 %v616_v2  ;;  %v643_v8 = vand.u32 2147483648, %v616_v2  ;;  %vm637_vm6 = vweird.f32 %v616_v2  ;;  %v641_v10 = vand.u32 2147483647, %v616_v2 }
 0x7b9   :  { %v644_v12 = vor.u32 1.1754944e-38, %v643_v8  ;;  %vm642_vm8 = vcmp.eq.f32.partialorder %v641_v10, 8.507059e+37 }
 0x7bd   :  { %v1324_v3 = vpop.eup %1323 }
 0x7be   :  { %v633_v4 = vmul.f32 %v1324_v3, %v616_v2  ;;  %vm638_vm5 = vweird.f32 %v1324_v3 }
 0x7bf   :  { %vm639_vm7 = vmor %vm637_vm6, %vm638_vm5 }
 0x7c0   :  { %v634_v5 = vsub.f32 1.0, %v633_v4 }
 0x7c2   :  { %v635_v6 = vmul.f32 %v1324_v3, %v634_v5 }
 0x7c4   :  { %v636_v7 = vadd.f32 %v1324_v3, %v635_v6  ;;  %v210_v6 = vadd.f32 %v1692_v21, %v1605_v55 }
 0x7c6   :  { %v640_v11 = vsel %vm639_vm7, %v1324_v3, %v636_v7  ;;  %v181_v7 = vadd.f32 %v1690_v15, %v1609_v0 }
 0x7c7   :  { %v645_v14 = vsel %vm642_vm8, %v644_v12, %v640_v11 }
 0x80e   :  { %v662_v16 = vpop.permute.xlu2 %661 }
 0x80f   :  { %v664_v17 = vmul.f32 %v662_v16, %v645_v14 }
 0x811   :  { %666 = vst.msk [vmem:[#allocation4 + $0x18] sm:$0xff] %vm373_vm11, %v664_v17  ;;  %v674_v18 = vpack.c.bf16 %v664_v17, %v664_v17 }
 0x812   :  { %668 = vst.msk [vmem:[#allocation4 + $0x20] sm:$0xff] %vm376_vm12, %v664_v17 }
 0x813   :  { %1204 = vmatmul.msk.bf16.vlgmr.msrb.gmra.mxu0 %vm146_vm2, %v674_v18  ;;  %1205 = vmatmul.msk.bf16.vlgmr.msrb.gmra.mxu1 %vm146_vm2, %v674_v18 }
 0x890   :  { %v687_v30 = vpop.f32.mrf.mxu0  ;;  %v700_v31 = vpop.f32.mrf.mxu1 }
 0x891   :  { %v704_v32 = vadd.f32 %v687_v30, %v179_v28  ;;  %v705_v33 = vadd.f32 %v700_v31, %v208_v29 }
 0x893   :  { %1325 = vtanh.f32 %v705_v33  ;;  %v1206_v13 = vmul.f32 -1.442695, %v704_v32  ;;  %v1207_v52 = vmul.f32 -1.442695, %v705_v33 }
 0x895   :  { %1327 = vpow2.f32 %v1206_v13 }
 0x898   :  { %v689_v9 = vpop.f32.mrf.mxu0  ;;  %v702_v23 = vpop.f32.mrf.mxu1 }
 0x899   :  { %v1326_v35 = vpop.eup %1325 }
 0x89a   :  { %747 = vrot.lane.b32.xlu0 %v1326_v35, %s1451_s21 }
 0x89b   :  { %v1328_v34 = vpop.eup %1327 }
 0x89c   :  { %v712_v27 = vadd.f32 1.0, %v1328_v34 }
 0x89e   :  { %1329 = vrcp.f32 %v712_v27  ;;  %v725_v38 = vand.u32 2147483648, %v712_v27  ;;  %vm719_vm10 = vweird.f32 %v712_v27  ;;  %v723_v39 = vand.u32 2147483647, %v712_v27 }
 0x8a0   :  { %v726_v41 = vor.u32 1.1754944e-38, %v725_v38  ;;  %vm724_vm14 = vcmp.eq.f32.partialorder %v723_v39, 8.507059e+37 }
 0x8a4   :  { %v1330_v44 = vpop.eup %1329 }
 0x8a5   :  { %v715_v36 = vmul.f32 %v1330_v44, %v712_v27  ;;  %vm720_vm9 = vweird.f32 %v1330_v44 }
 0x8a6   :  { %vm721_vm13 = vmor %vm719_vm10, %vm720_vm9 }
 0x8a7   :  { %v716_v43 = vsub.f32 1.0, %v715_v36 }
 0x8a9   :  { %v717_v51 = vmul.f32 %v1330_v44, %v716_v43 }
 0x8ab   :  { %v718_v37 = vadd.f32 %v1330_v44, %v717_v51 }
 0x8ad   :  { %v722_v40 = vsel %vm721_vm13, %v1330_v44, %v718_v37 }
 0x8ae   :  { %v727_v45 = vsel %vm724_vm14, %v726_v41, %v722_v40 }
 0x8af   :  { %v745_v47 = vmul.f32 %v727_v45, %v1682_v61 }
 0x90c   :  { %v748_v42 = vpop.permute.xlu0 %747 }
 0x90d   :  { %v750_v46 = vmul.f32 %v748_v42, %v727_v45 }
 0x90f   :  { %752 = vrot.lane.b32.xlu1 %v750_v46, %s1451_s21 }
 0x981   :  { %v753_v48 = vpop.permute.xlu1 %752 }
 0x982   :  { %v1707_v49 = vadd.f32 %v753_v48, %v745_v47 }
 0x984   :  { %1331 = vtanh.f32 %v1707_v49 }
 0x985   :  { %1333 = vpow2.f32 %v1207_v52 }
 0x98a   :  { %v1332_v50 = vpop.eup %1331 }
 0x98b   :  { %758 = vrot.lane.b32.xlu2 %v1332_v50, %s1451_s21  ;;  %v1334_v53 = vpop.eup %1333 }
 0x98c   :  { %v713_v54 = vadd.f32 1.0, %v1334_v53 }
 0x98e   :  { %1335 = vrcp.f32 %v713_v54  ;;  %v740_v61 = vand.u32 2147483648, %v713_v54  ;;  %vm734_vm0 = vweird.f32 %v713_v54  ;;  %v738_v62 = vand.u32 2147483647, %v713_v54 }
 0x990   :  { %v741_v1 = vor.u32 1.1754944e-38, %v740_v61  ;;  %vm739_vm3 = vcmp.eq.f32.partialorder %v738_v62, 8.507059e+37 }
 0x994   :  { %v1336_v56 = vpop.eup %1335 }
 0x995   :  { %v730_v57 = vmul.f32 %v1336_v56, %v713_v54  ;;  %vm735_vm15 = vweird.f32 %v1336_v56  ;;  %v213_v54 = vadd.f32 %v1696_v24, %v1605_v55 }
 0x996   :  { %vm736_vm1 = vmor %vm734_vm0, %vm735_vm15 }
 0x997   :  { %v731_v58 = vsub.f32 1.0, %v730_v57 }
 0x999   :  { %v732_v59 = vmul.f32 %v1336_v56, %v731_v58 }
 0x99b   :  { %v733_v60 = vadd.f32 %v1336_v56, %v732_v59 }
 0x99d   :  { %v737_v63 = vsel %vm736_vm1, %v1336_v56, %v733_v60  ;;  %v184_v56 = vadd.f32 %v1694_v22, %v1609_v0 }
 0x99e   :  { %v742_v2 = vsel %vm739_vm3, %v741_v1, %v737_v63 }
 0x9e5   :  { %v759_v3 = vpop.permute.xlu2 %758 }
 0x9e6   :  { %v761_v4 = vmul.f32 %v759_v3, %v742_v2 }
 0x9e8   :  { %762 = vst.msk [vmem:[#allocation4 + $0x20] sm:$0xff] %vm373_vm11, %v761_v4  ;;  %v769_v5 = vpack.c.bf16 %v761_v4, %v761_v4 }
 0x9e9   :  { %763 = vst.msk [vmem:[#allocation4 + $0x18] sm:$0xff] %vm376_vm12, %v761_v4 }
 0x9ea   :  { %1208 = vmatmul.msk.bf16.vlgmr.msra.gmra.mxu2 %vm146_vm2, %v769_v5  ;;  %1209 = vmatmul.msk.bf16.vlgmr.msra.gmra.mxu3 %vm146_vm2, %v769_v5 }
 0xa6d   :  { %v782_v8 = vpop.f32.mrf.mxu2  ;;  %v795_v10 = vpop.f32.mrf.mxu3 }
 0xa6e   :  { %v799_v11 = vadd.f32 %v782_v8, %v181_v7  ;;  %v800_v12 = vadd.f32 %v795_v10, %v210_v6 }
 0xa70   :  { %1337 = vtanh.f32 %v800_v12  ;;  %v1210_v18 = vmul.f32 -1.442695, %v799_v11  ;;  %v1211_v43 = vmul.f32 -1.442695, %v800_v12 }
 0xa72   :  { %1339 = vpow2.f32 %v1210_v18 }
 0xa75   :  { %v784_v14 = vpop.f32.mrf.mxu2  ;;  %v797_v16 = vpop.f32.mrf.mxu3 }
 0xa76   :  { %v1338_v17 = vpop.eup %1337 }
 0xa77   :  { %842 = vrot.lane.b32.xlu0 %v1338_v17, %s1451_s21 }
 0xa78   :  { %v1340_v19 = vpop.eup %1339 }
 0xa79   :  { %v807_v20 = vadd.f32 1.0, %v1340_v19 }
 0xa7b   :  { %1341 = vrcp.f32 %v807_v20  ;;  %v820_v31 = vand.u32 2147483648, %v807_v20  ;;  %vm814_vm5 = vweird.f32 %v807_v20  ;;  %v818_v32 = vand.u32 2147483647, %v807_v20 }
 0xa7d   :  { %v821_v9 = vor.u32 1.1754944e-38, %v820_v31  ;;  %vm819_vm7 = vcmp.eq.f32.partialorder %v818_v32, 8.507059e+37 }
 0xa81   :  { %v1342_v28 = vpop.eup %1341 }
 0xa82   :  { %v810_v21 = vmul.f32 %v1342_v28, %v807_v20  ;;  %vm815_vm4 = vweird.f32 %v1342_v28 }
 0xa83   :  { %vm816_vm6 = vmor %vm814_vm5, %vm815_vm4 }
 0xa84   :  { %v811_v29 = vsub.f32 1.0, %v810_v21 }
 0xa86   :  { %v812_v30 = vmul.f32 %v1342_v28, %v811_v29 }
 0xa88   :  { %v813_v15 = vadd.f32 %v1342_v28, %v812_v30 }
 0xa8a   :  { %v817_v33 = vsel %vm816_vm6, %v1342_v28, %v813_v15 }
 0xa8b   :  { %v822_v35 = vsel %vm819_vm7, %v821_v9, %v817_v33 }
 0xa8c   :  { %v840_v34 = vmul.f32 %v822_v35, %v1707_v49 }
 0xae9   :  { %v843_v23 = vpop.permute.xlu0 %842 }
 0xaea   :  { %v845_v13 = vmul.f32 %v843_v23, %v822_v35 }
 0xaec   :  { %847 = vrot.lane.b32.xlu1 %v845_v13, %s1451_s21 }
 0xb5e   :  { %v848_v27 = vpop.permute.xlu1 %847 }
 0xb5f   :  { %v1722_v44 = vadd.f32 %v848_v27, %v840_v34 }
 0xb61   :  { %1343 = vtanh.f32 %v1722_v44 }
 0xb62   :  { %1345 = vpow2.f32 %v1211_v43  ;;  %v215_v43 = vadd.f32 %v1700_v26, %v1605_v55 }
 0xb67   :  { %v1344_v36 = vpop.eup %1343 }
 0xb68   :  { %853 = vrot.lane.b32.xlu2 %v1344_v36, %s1451_s21  ;;  %v1346_v51 = vpop.eup %1345 }
 0xb69   :  { %v808_v37 = vadd.f32 1.0, %v1346_v51 }
 0xb6b   :  { %1347 = vrcp.f32 %v808_v37  ;;  %v835_v45 = vand.u32 2147483648, %v808_v37  ;;  %vm829_vm9 = vweird.f32 %v808_v37  ;;  %v833_v46 = vand.u32 2147483647, %v808_v37 }
 0xb6d   :  { %v836_v48 = vor.u32 1.1754944e-38, %v835_v45  ;;  %vm834_vm13 = vcmp.eq.f32.partialorder %v833_v46, 8.507059e+37 }
 0xb71   :  { %v1348_v38 = vpop.eup %1347 }
 0xb72   :  { %v825_v39 = vmul.f32 %v1348_v38, %v808_v37  ;;  %vm830_vm8 = vweird.f32 %v1348_v38 }
 0xb73   :  { %vm831_vm10 = vmor %vm829_vm9, %vm830_vm8 }
 0xb74   :  { %v826_v40 = vsub.f32 1.0, %v825_v39 }
 0xb76   :  { %v827_v41 = vmul.f32 %v1348_v38, %v826_v40 }
 0xb78   :  { %v828_v42 = vadd.f32 %v1348_v38, %v827_v41 }
 0xb7a   :  { %v832_v47 = vsel %vm831_vm10, %v1348_v38, %v828_v42  ;;  %v186_v42 = vadd.f32 %v1698_v25, %v1609_v0 }
 0xb7b   :  { %v837_v49 = vsel %vm834_vm13, %v836_v48, %v832_v47 }
 0xbc2   :  { %v854_v50 = vpop.permute.xlu2 %853 }
 0xbc3   :  { %v856_v52 = vmul.f32 %v854_v50, %v837_v49 }
 0xbc5   :  { %857 = vst.msk [vmem:[#allocation4 + $0x28] sm:$0xff] %vm373_vm11, %v856_v52  ;;  %v864_v53 = vpack.c.bf16 %v856_v52, %v856_v52 }
 0xbc6   :  { %858 = vst.msk [vmem:[#allocation4 + $0x10] sm:$0xff] %vm376_vm12, %v856_v52 }
 0xbc7   :  { %1212 = vmatmul.msk.bf16.vlgmr.msra.gmra.mxu0 %vm146_vm2, %v864_v53  ;;  %1213 = vmatmul.msk.bf16.vlgmr.msra.gmra.mxu1 %vm146_vm2, %v864_v53 }
 0xc44   :  { %v877_v57 = vpop.f32.mrf.mxu0  ;;  %v890_v58 = vpop.f32.mrf.mxu1 }
 0xc45   :  { %v894_v59 = vadd.f32 %v877_v57, %v184_v56  ;;  %v895_v60 = vadd.f32 %v890_v58, %v213_v54 }
 0xc47   :  { %1349 = vtanh.f32 %v895_v60  ;;  %v1214_v1 = vmul.f32 -1.442695, %v894_v59  ;;  %v1215_v28 = vmul.f32 -1.442695, %v895_v60 }
 0xc49   :  { %1351 = vpow2.f32 %v1214_v1 }
 0xc4c   :  { %v879_v61 = vpop.f32.mrf.mxu0  ;;  %v892_v62 = vpop.f32.mrf.mxu1 }
 0xc4d   :  { %v1350_v63 = vpop.eup %1349 }
 0xc4e   :  { %937 = vrot.lane.b32.xlu0 %v1350_v63, %s1451_s21 }
 0xc4f   :  { %v1352_v2 = vpop.eup %1351 }
 0xc50   :  { %v902_v3 = vadd.f32 1.0, %v1352_v2 }
 0xc52   :  { %1353 = vrcp.f32 %v902_v3  ;;  %v915_v7 = vand.u32 2147483648, %v902_v3  ;;  %vm909_vm15 = vweird.f32 %v902_v3  ;;  %v913_v8 = vand.u32 2147483647, %v902_v3 }
 0xc54   :  { %v916_v11 = vor.u32 1.1754944e-38, %v915_v7  ;;  %vm914_vm1 = vcmp.eq.f32.partialorder %v913_v8, 8.507059e+37 }
 0xc58   :  { %v1354_v4 = vpop.eup %1353 }
 0xc59   :  { %v905_v24 = vmul.f32 %v1354_v4, %v902_v3  ;;  %vm910_vm14 = vweird.f32 %v1354_v4 }
 0xc5a   :  { %vm911_vm0 = vmor %vm909_vm15, %vm910_vm14 }
 0xc5b   :  { %v906_v5 = vsub.f32 1.0, %v905_v24 }
 0xc5d   :  { %v907_v6 = vmul.f32 %v1354_v4, %v906_v5 }
 0xc5f   :  { %v908_v22 = vadd.f32 %v1354_v4, %v907_v6 }
 0xc61   :  { %v912_v10 = vsel %vm911_vm0, %v1354_v4, %v908_v22 }
 0xc62   :  { %v917_v14 = vsel %vm914_vm1, %v916_v11, %v912_v10 }
 0xc63   :  { %v935_v17 = vmul.f32 %v917_v14, %v1722_v44 }
 0xcc0   :  { %v938_v12 = vpop.permute.xlu0 %937 }
 0xcc1   :  { %v940_v16 = vmul.f32 %v938_v12, %v917_v14 }
 0xcc3   :  { %942 = vrot.lane.b32.xlu1 %v940_v16, %s1451_s21 }
 0xd35   :  { %v943_v18 = vpop.permute.xlu1 %942 }
 0xd36   :  { %v1737_v19 = vadd.f32 %v943_v18, %v935_v17 }
 0xd38   :  { %1355 = vtanh.f32 %v1737_v19 }
 0xd39   :  { %1357 = vpow2.f32 %v1215_v28 }
 0xd3e   :  { %v1356_v20 = vpop.eup %1355 }
 0xd3f   :  { %948 = vrot.lane.b32.xlu2 %v1356_v20, %s1451_s21  ;;  %v1358_v21 = vpop.eup %1357 }
 0xd40   :  { %v903_v29 = vadd.f32 1.0, %v1358_v21 }
 0xd42   :  { %1359 = vrcp.f32 %v903_v29  ;;  %v930_v9 = vand.u32 2147483648, %v903_v29  ;;  %vm924_vm4 = vweird.f32 %v903_v29  ;;  %v928_v23 = vand.u32 2147483647, %v903_v29 }
 0xd44   :  { %v931_v13 = vor.u32 1.1754944e-38, %v930_v9  ;;  %vm929_vm6 = vcmp.eq.f32.partialorder %v928_v23, 8.507059e+37 }
 0xd48   :  { %v1360_v30 = vpop.eup %1359 }
 0xd49   :  { %v920_v15 = vmul.f32 %v1360_v30, %v903_v29  ;;  %vm925_vm3 = vweird.f32 %v1360_v30 }
 0xd4a   :  { %vm926_vm5 = vmor %vm924_vm4, %vm925_vm3 }
 0xd4b   :  { %v921_v31 = vsub.f32 1.0, %v920_v15 }
 0xd4d   :  { %v922_v32 = vmul.f32 %v1360_v30, %v921_v31 }
 0xd4f   :  { %v923_v33 = vadd.f32 %v1360_v30, %v922_v32 }
 0xd51   :  { %v927_v35 = vsel %vm926_vm5, %v1360_v30, %v923_v33 }
 0xd52   :  { %v932_v34 = vsel %vm929_vm6, %v931_v13, %v927_v35 }
 0xd99   :  { %v949_v27 = vpop.permute.xlu2 %948 }
 0xd9a   :  { %v951_v44 = vmul.f32 %v949_v27, %v932_v34 }
 0xd9c   :  { %952 = vst.msk [vmem:[#allocation4 + $0x30] sm:$0xff] %vm373_vm11, %v951_v44  ;;  %v959_v36 = vpack.c.bf16 %v951_v44, %v951_v44 }
 0xd9d   :  { %953 = vst.msk [vmem:[#allocation4 + $0x8] sm:$0xff] %vm376_vm12, %v951_v44 }
 0xd9e   :  { %1216 = vmatmul.msk.bf16.vlgmr.msrb.gmra.mxu2 %vm146_vm2, %v959_v36  ;;  %1217 = vmatmul.msk.bf16.vlgmr.msrb.gmra.mxu3 %vm146_vm2, %v959_v36 }
 0xe21   :  { %v972_v51 = vpop.f32.mrf.mxu2  ;;  %v985_v37 = vpop.f32.mrf.mxu3 }
 0xe22   :  { %v990_v38 = vadd.f32 %v985_v37, %v215_v43  ;;  %v989_v45 = vadd.f32 %v972_v51, %v186_v42 }
 0xe24   :  { %1361 = vtanh.f32 %v990_v38  ;;  %v1218_v46 = vmul.f32 -1.442695, %v989_v45  ;;  %v1219_v63 = vmul.f32 -1.442695, %v990_v38 }
 0xe26   :  { %1363 = vpow2.f32 %v1218_v46 }
 0xe29   :  { %v974_v39 = vpop.f32.mrf.mxu2  ;;  %v987_v40 = vpop.f32.mrf.mxu3 }
 0xe2a   :  { %v1362_v41 = vpop.eup %1361 }
 0xe2b   :  { %1032 = vrot.lane.b32.xlu0 %v1362_v41, %s1451_s21 }
 0xe2c   :  { %v1364_v47 = vpop.eup %1363 }
 0xe2d   :  { %v997_v48 = vadd.f32 1.0, %v1364_v47 }
 0xe2f   :  { %1365 = vrcp.f32 %v997_v48  ;;  %v1010_v53 = vand.u32 2147483648, %v997_v48  ;;  %vm1004_vm7 = vweird.f32 %v997_v48  ;;  %v1008_v54 = vand.u32 2147483647, %v997_v48 }
 0xe31   :  { %v1011_v57 = vor.u32 1.1754944e-38, %v1010_v53  ;;  %vm1009_vm9 = vcmp.eq.f32.partialorder %v1008_v54, 8.507059e+37 }
 0xe35   :  { %v1366_v49 = vpop.eup %1365 }
 0xe36   :  { %v1000_v55 = vmul.f32 %v1366_v49, %v997_v48  ;;  %vm1005_vm2 = vweird.f32 %v1366_v49 }
 0xe37   :  { %vm1006_vm8 = vmor %vm1004_vm7, %vm1005_vm2 }
 0xe38   :  { %v1001_v26 = vsub.f32 1.0, %v1000_v55 }
 0xe3a   :  { %v1002_v50 = vmul.f32 %v1366_v49, %v1001_v26 }
 0xe3c   :  { %v1003_v52 = vadd.f32 %v1366_v49, %v1002_v50 }
 0xe3e   :  { %v1007_v56 = vsel %vm1006_vm8, %v1366_v49, %v1003_v52 }
 0xe3f   :  { %v1012_v25 = vsel %vm1009_vm9, %v1011_v57, %v1007_v56 }
 0xe40   :  { %v1030_v59 = vmul.f32 %v1012_v25, %v1737_v19 }
 0xe9d   :  { %v1033_v0 = vpop.permute.xlu0 %1032 }
 0xe9e   :  { %v1035_v58 = vmul.f32 %v1033_v0, %v1012_v25 }
 0xea0   :  { %1037 = vrot.lane.b32.xlu1 %v1035_v58, %s1451_s21 }
 0xf12   :  { %v1038_v60 = vpop.permute.xlu1 %1037 }
 0xf13   :  { %v1040_v61 = vadd.f32 %v1038_v60, %v1030_v59 }
 0xf15   :  { %1367 = vtanh.f32 %v1040_v61 }
 0xf16   :  { %1369 = vpow2.f32 %v1219_v63 }
 0xf1b   :  { %v1368_v62 = vpop.eup %1367 }
 0xf1c   :  { %1043 = vrot.lane.b32.xlu2 %v1368_v62, %s1451_s21  ;;  %v1370_v1 = vpop.eup %1369 }
 0xf1d   :  { %v998_v2 = vadd.f32 1.0, %v1370_v1 }
 0xf1f   :  { %1371 = vrcp.f32 %v998_v2  ;;  %v1025_v22 = vand.u32 2147483648, %v998_v2  ;;  %vm1019_vm13 = vweird.f32 %v998_v2  ;;  %v1023_v7 = vand.u32 2147483647, %v998_v2 }
 0xf21   :  { %v1026_v10 = vor.u32 1.1754944e-38, %v1025_v22  ;;  %vm1024_vm15 = vcmp.eq.f32.partialorder %v1023_v7, 8.507059e+37 }
 0xf25   :  { %v1372_v3 = vpop.eup %1371 }
 0xf26   :  { %v1015_v4 = vmul.f32 %v1372_v3, %v998_v2  ;;  %vm1020_vm10 = vweird.f32 %v1372_v3 }
 0xf27   :  { %vm1021_vm14 = vmor %vm1019_vm13, %vm1020_vm10 }
 0xf28   :  { %v1016_v24 = vsub.f32 1.0, %v1015_v4 }
 0xf2a   :  { %v1017_v5 = vmul.f32 %v1372_v3, %v1016_v24 }
 0xf2c   :  { %v1018_v6 = vadd.f32 %v1372_v3, %v1017_v5 }
 0xf2e   :  { %v1022_v8 = vsel %vm1021_vm14, %v1372_v3, %v1018_v6 }
 0xf2f   :  { %v1027_v11 = vsel %vm1024_vm15, %v1026_v10, %v1022_v8 }
 0xf76   :  { %v1044_v12 = vpop.permute.xlu2 %1043 }
 0xf77   :  { %v1046_v14 = vmul.f32 %v1044_v12, %v1027_v11 }
 0xf79   :  { %1047 = vst.msk [vmem:[#allocation4 + $0x38] sm:$0xff] %vm373_vm11, %v1046_v14 }
 0xf7a   :  { %1048 = vst.msk [vmem:[#allocation4] sm:$0xff] %vm376_vm12, %v1046_v14 }
 0xf7b LB: > { %s1220_s22 = sshll.u32 %s1439_s4, 3  ;;  %s1441_s23 = smov 0   ;;  %s1439_s4 = sphi %s1437_s4, %s1054_s4  }
 0xf7c LB: >> { %s1062_s1 = sadd.s32 %s1443_s23, %s1220_s22  ;;  %s1221_s24 = sshll.u32 %s1443_s23, 3  ;;  %vm1068_vm0 = vcmask 516096   ;;  %s1443_s23 = sphi %s1441_s23, %s1061_s23  }
 0xf7d   : >> { %s1066_s25 = sadd.s32 %s1439_s4, %s1221_s24  ;;  %s1063_s26 = scalar_lea.vmem [#allocation4], %s1062_s1 }
 0xf7e   : >> { %s1067_s0 = scalar_lea.vmem %s1763_s5, %s1066_s25  ;;  %s1061_s23 = sadd.s32 1, %s1443_s23  }
 0xf7f   : >> { %p1058_p2 = scmp.ge.s32.totalorder %s1061_s23, 8  }
 0xf80   : > { %s1054_s4 = sadd.s32 (%p1058_p2), 1, %s1439_s4  }
 0xf81   : >> { %v1064_v16 = vld [vmem:[%s1063_s26] sm:$0x1]  ;;  %1060 = sbr.rel (!%p1058_p2) target bundleno = 3964 (0xf7c), region = 118  ;;  %p1051_p3 = scmp.ge.s32.totalorder (%p1058_p2), %s1054_s4, 8  }
 0xf82   : >> { %1069 = vst.msk [vmem:[%s1067_s0] sm:$0x1] %vm1068_vm0, %v1064_v16 }
 0xf86   :  { %1053 = sbr.rel (!%p1051_p3) target bundleno = 3963 (0xf7b), region = 129 }
 0xf8b   :  { %1074 = vsyncpa [#allocation6], 1 }
 0xf8c   :  { %1075 = vsyncpa [#allocation7], 1 }

</bundles_post_ra>
